<compile_context>
chip_gen: v7x
topology: tpu7x:2x2x1
jax: 0.10.0
libtpu: 0.0.40
codegen_flags: <defaults>
</compile_context>

<pallas_src>
import jax
import jax.numpy as jnp
from jax.experimental import pallas as pl
from jax.experimental.pallas import tpu as pltpu

# ------------------------- small synthetic config -------------------------
VOCAB = 128
B, S, H = 2, 8, 32          # batch, seq, hidden
NH, DH = 2, 16              # heads, head dim (NH*DH == H)
FFN = 64                    # feed-forward width
NUM_LAYERS = 2
NUM_CLASSES = 5
C_PAD = 128                 # lane-dense padded output width
LN_EPS = 1e-12


# ------------------------------ fused kernel ------------------------------
def _make_encoder_kernel(include_hidden):
    def kernel(ids_ref, mask_ref,
               tok_ref, pos_ref,
               emb_g_ref, emb_b_ref,
               qkv_w_ref, qkv_b_ref,
               ow_ref, ob_ref,
               ln1_g_ref, ln1_b_ref,
               ff1_w_ref, ff1_b_ref,
               ff2_w_ref, ff2_b_ref,
               ln2_g_ref, ln2_b_ref,
               cls_w_ref, cls_b_ref,
               logits_ref, hidden_ref=None):
        BS = ids_ref.shape[0]
        scale = 1.0 / float(DH) ** 0.5
        bf16 = jnp.bfloat16

        def layernorm(v, g, b):
            # single pass over v: var = E[x^2] - mean^2 (reductions independent)
            mean = jnp.mean(v, axis=-1, keepdims=True)
            msq = jnp.mean(v * v, axis=-1, keepdims=True)
            var = jnp.maximum(msq - mean * mean, 0.0)
            return (v - mean) * jax.lax.rsqrt(var + jnp.float32(LN_EPS)) * g + b

        # ---- in-kernel embedding gather: one-hot @ table == exact row gather ----
        onehot = (ids_ref[...] ==
                  jax.lax.broadcasted_iota(jnp.int32, (BS, VOCAB), 1)
                  ).astype(jnp.float32)
        x = jnp.dot(onehot, tok_ref[...], preferred_element_type=jnp.float32)
        x = (x.reshape(B, S, H) + pos_ref[...][None]).reshape(BS, H)
        x = layernorm(x, emb_g_ref[...], emb_b_ref[...])

        # additive attention-mask bias, hoisted out of the layer loop.
        # heads are merged into the batch dim in (head, batch) order -> tile.
        bias_hb = jnp.tile(mask_ref[...][:, None, :], (NH, 1, 1))  # [NH*B, 1, S]

        for l in range(NUM_LAYERS):                 # static unrolled loop
            # ---- fused QKV projection (bf16 MXU, f32 accumulate) ----
            qkv = (jnp.dot(x.astype(bf16), qkv_w_ref[l],
                           preferred_element_type=jnp.float32)
                   + qkv_b_ref[l]).astype(bf16)     # [BS, 3H]

            # merge heads into the batch dim ((h, b, s) row order) so the whole
            # attention block is 2 batched einsums + 1 output projection.
            def heads(base):
                return jnp.concatenate(
                    [qkv[:, base + h * DH: base + (h + 1) * DH]
                     for h in range(NH)], axis=0).reshape(NH * B, S, DH)

            q, k, v = heads(0), heads(H), heads(2 * H)

            s = jnp.einsum("bqd,bkd->bqk", q, k,
                           preferred_element_type=jnp.float32) * scale
            s = s + bias_hb
            m = jnp.max(s, axis=-1, keepdims=True)
            p = jnp.exp(s - m)
            p = p * pl.reciprocal(jnp.sum(p, axis=-1, keepdims=True), approx=True)
            o = jnp.einsum("bqk,bkd->bqd", p.astype(bf16), v,
                           preferred_element_type=jnp.float32)  # [NH*B, S, DH]

            # un-merge heads back to [BS, H] and do ONE output projection.
            o = o.reshape(NH, BS, DH)
            o = jnp.concatenate([o[h] for h in range(NH)], axis=1)  # [BS, H]
            a = (jnp.dot(o.astype(bf16), ow_ref[l],
                         preferred_element_type=jnp.float32) + ob_ref[l])
            x = layernorm(a + x, ln1_g_ref[l], ln1_b_ref[l])

            # ---- feed-forward (bf16 MXU, f32 elementwise) ----
            f = (jnp.dot(x.astype(bf16), ff1_w_ref[l],
                         preferred_element_type=jnp.float32) + ff1_b_ref[l])
            # tanh-approx GELU (HF BERT uses erf-GELU; minor numerical divergence)
            c = jnp.float32(0.7978845608028654)     # sqrt(2/pi)
            f = 0.5 * f * (1.0 + jnp.tanh(c * (f + 0.044715 * f * f * f)))
            f = (jnp.dot(f.astype(bf16), ff2_w_ref[l],
                         preferred_element_type=jnp.float32) + ff2_b_ref[l])
            x = layernorm(f + x, ln2_g_ref[l], ln2_b_ref[l])

        # ---- outputs: lane-dense [BS, 128] slabs (unmasked vst) ----
        logits = (jnp.dot(x.astype(bf16), cls_w_ref[...],
                          preferred_element_type=jnp.float32) + cls_b_ref[...])
        logits_ref[...] = logits.astype(logits_ref.dtype)
        if include_hidden:
            hid = jnp.concatenate(
                [x, jnp.zeros((BS, C_PAD - H), jnp.float32)], axis=1)
            hidden_ref[...] = hid.astype(hidden_ref.dtype)

    return kernel


def _full_spec(shape):
    zeros = (0,) * len(shape)
    return pl.BlockSpec(shape, lambda i: zeros)


def _cost_estimate(inputs, n_outputs, BS):
    per_layer = (2 * BS * H * 3 * H            # fused qkv projection
                 + 4 * B * NH * S * S * DH     # scores + PV
                 + 2 * BS * H * H              # output projection
                 + 4 * BS * H * FFN)           # ff1 + ff2
    flops = 2 * BS * VOCAB * H + NUM_LAYERS * per_layer + 2 * BS * H * C_PAD
    transcendentals = (NUM_LAYERS * (B * NH * S * S + BS * FFN)
                       + (2 * NUM_LAYERS + 1) * BS)
    bytes_accessed = (sum(a.size * a.dtype.itemsize for a in inputs)
                      + n_outputs * BS * C_PAD * 4)
    return pl.CostEstimate(flops=int(flops),
                           transcendentals=int(transcendentals),
                           bytes_accessed=int(bytes_accessed))


def _encoder_call(ids2, mask_bias, params, return_h):
    inputs = (ids2, mask_bias,
              params["tok_emb"], params["pos_emb"],
              params["emb_ln_g"], params["emb_ln_b"],
              params["qkv_w"], params["qkv_b"],
              params["o_w"], params["o_b"],
              params["ln1_g"], params["ln1_b"],
              params["ff1_w"], params["ff1_b"],
              params["ff2_w"], params["ff2_b"],
              params["ln2_g"], params["ln2_b"],
              params["cls_w"], params["cls_b"])
    BS = ids2.shape[0]

    if return_h:
        out_shape = (jax.ShapeDtypeStruct((BS, C_PAD), jnp.float32),
                     jax.ShapeDtypeStruct((BS, C_PAD), jnp.float32))
        out_specs = (_full_spec((BS, C_PAD)), _full_spec((BS, C_PAD)))
    else:
        out_shape = jax.ShapeDtypeStruct((BS, C_PAD), jnp.float32)
        out_specs = _full_spec((BS, C_PAD))

    return pl.pallas_call(
        _make_encoder_kernel(return_h),
        out_shape=out_shape,
        grid=(1,),
        in_specs=[_full_spec(a.shape) for a in inputs],
        out_specs=out_specs,
        compiler_params=pltpu.CompilerParams(
            dimension_semantics=("arbitrary",)),
        cost_estimate=_cost_estimate(inputs, 2 if return_h else 1, BS),
    )(*inputs)


# --------------------------- parameters & forward ---------------------------
def init_params(key):
    keys = iter(jax.random.split(key, 4 + 6 * NUM_LAYERS))
    std = 0.02

    def dense(kin, kout):
        return (std * jax.random.normal(next(keys), (kin, kout), jnp.float32),
                jnp.zeros((1, kout), jnp.float32))

    tok_emb = std * jax.random.normal(next(keys), (VOCAB, H), jnp.float32)
    pos_emb = std * jax.random.normal(next(keys), (S, H), jnp.float32)

    # classifier: xavier-normal weight, zero bias (== HFTC.init_weights),
    # zero-padded to a lane-dense 128-wide output slab.
    cls_w = jax.nn.initializers.glorot_normal()(
        next(keys), (H, NUM_CLASSES), jnp.float32)
    cls_w_pad = jnp.zeros((H, C_PAD), jnp.float32).at[:, :NUM_CLASSES].set(cls_w)
    cls_b_pad = jnp.zeros((1, C_PAD), jnp.float32)

    qkv_w, qkv_b = [], []
    o_w, o_b = [], []
    ff1_w, ff1_b = [], []
    ff2_w, ff2_b = [], []
    for _ in range(NUM_LAYERS):
        qw, qb = dense(H, H)
        kw, kb = dense(H, H)
        vw, vb = dense(H, H)
        qkv_w.append(jnp.concatenate([qw, kw, vw], axis=1))   # [H, 3H]
        qkv_b.append(jnp.concatenate([qb, kb, vb], axis=1))   # [1, 3H]
        w, b_ = dense(H, H); o_w.append(w); o_b.append(b_)
        w, b_ = dense(H, FFN); ff1_w.append(w); ff1_b.append(b_)
        w, b_ = dense(FFN, H); ff2_w.append(w); ff2_b.append(b_)

    bf16 = jnp.bfloat16
    return {
        "tok_emb": tok_emb,                           # f32: exact one-hot gather
        "pos_emb": pos_emb,
        "emb_ln_g": jnp.ones((1, H), jnp.float32),
        "emb_ln_b": jnp.zeros((1, H), jnp.float32),
        "qkv_w": jnp.stack(qkv_w).astype(bf16),       # [L, H, 3H] bf16 MXU operand
        "qkv_b": jnp.stack(qkv_b),                    # [L, 1, 3H] f32
        "o_w": jnp.stack(o_w).astype(bf16),           # [L, H, H]
        "o_b": jnp.stack(o_b),                        # [L, 1, H]
        "ln1_g": jnp.ones((NUM_LAYERS, 1, H), jnp.float32),
        "ln1_b": jnp.zeros((NUM_LAYERS, 1, H), jnp.float32),
        "ff1_w": jnp.stack(ff1_w).astype(bf16),       # [L, H, FFN]
        "ff1_b": jnp.stack(ff1_b),                    # [L, 1, FFN]
        "ff2_w": jnp.stack(ff2_w).astype(bf16),       # [L, FFN, H]
        "ff2_b": jnp.stack(ff2_b),                    # [L, 1, H]
        "ln2_g": jnp.ones((NUM_LAYERS, 1, H), jnp.float32),
        "ln2_b": jnp.zeros((NUM_LAYERS, 1, H), jnp.float32),
        "cls_w": cls_w_pad.astype(bf16),              # [H, 128]
        "cls_b": cls_b_pad,                           # [1, 128]
    }


def hftc_forward(params, data, mask, return_h=False):
    """data: int32 [B, S] token ids; mask: [B, S] attention mask (1=keep)."""
    Bq, Sq = data.shape
    # Everything (embedding gather included) runs inside one pallas_call;
    # the wrapper only reshapes ids and builds the additive mask bias.
    ids2 = data.reshape(Bq * Sq, 1).astype(jnp.int32)
    # HF-style extended attention mask: (1 - mask) * large_negative, [B, S]
    mask_bias = (1.0 - mask.astype(jnp.float32)) * jnp.float32(-1e9)

    if return_h:
        logits_pad, hidden_pad = _encoder_call(ids2, mask_bias, params, True)
        logits = logits_pad[:, :NUM_CLASSES].reshape(Bq, Sq, NUM_CLASSES)
        hidden = hidden_pad[:, :H].reshape(Bq, Sq, H)
        return logits, hidden

    logits_pad = _encoder_call(ids2, mask_bias, params, False)
    return logits_pad[:, :NUM_CLASSES].reshape(Bq, Sq, NUM_CLASSES)


# ----------------------------------- main -----------------------------------
if __name__ == "__main__":
    key = jax.random.PRNGKey(0)
    pkey, dkey = jax.random.split(key)
    params = init_params(pkey)

    data = jax.random.randint(dkey, (B, S), 0, VOCAB, dtype=jnp.int32)
    mask = jnp.ones((B, S), jnp.float32).at[:, S - 2:].set(0.0)  # pad last 2 toks

    forward = jax.jit(hftc_forward, static_argnames=("return_h",))

    logits, hidden = forward(params, data, mask, return_h=True)
    jax.block_until_ready((logits, hidden))

    assert logits.shape == (B, S, NUM_CLASSES)
    assert logits.dtype == jnp.float32
    assert hidden.shape == (B, S, H)
    assert bool(jnp.all(jnp.isfinite(logits))) and bool(jnp.all(jnp.isfinite(hidden)))

    logits_only = forward(params, data, mask, return_h=False)
    jax.block_until_ready(logits_only)
    assert logits_only.shape == (B, S, NUM_CLASSES)

    print("KERNEL_OK")
</pallas_src>

<mosaic_0001>
module attributes {stable_mosaic.version = 11 : i64} {
  func.func @kernel(%arg0: i32, %arg1: memref<16x1xi32, #tpu.memory_space<vmem>>, %arg2: memref<2x8xf32, #tpu.memory_space<vmem>>, %arg3: memref<128x32xf32, #tpu.memory_space<vmem>>, %arg4: memref<8x32xf32, #tpu.memory_space<vmem>>, %arg5: memref<1x32xf32, #tpu.memory_space<vmem>>, %arg6: memref<1x32xf32, #tpu.memory_space<vmem>>, %arg7: memref<2x32x96xbf16, #tpu.memory_space<vmem>>, %arg8: memref<2x1x96xf32, #tpu.memory_space<vmem>>, %arg9: memref<2x32x32xbf16, #tpu.memory_space<vmem>>, %arg10: memref<2x1x32xf32, #tpu.memory_space<vmem>>, %arg11: memref<2x1x32xf32, #tpu.memory_space<vmem>>, %arg12: memref<2x1x32xf32, #tpu.memory_space<vmem>>, %arg13: memref<2x32x64xbf16, #tpu.memory_space<vmem>>, %arg14: memref<2x1x64xf32, #tpu.memory_space<vmem>>, %arg15: memref<2x64x32xbf16, #tpu.memory_space<vmem>>, %arg16: memref<2x1x32xf32, #tpu.memory_space<vmem>>, %arg17: memref<2x1x32xf32, #tpu.memory_space<vmem>>, %arg18: memref<2x1x32xf32, #tpu.memory_space<vmem>>, %arg19: memref<32x128xbf16, #tpu.memory_space<vmem>>, %arg20: memref<1x128xf32, #tpu.memory_space<vmem>>, %arg21: memref<16x128xf32, #tpu.memory_space<vmem>>, %arg22: memref<16x128xf32, #tpu.memory_space<vmem>>) attributes {dimension_semantics = [#tpu.dimension_semantics<arbitrary>], iteration_bounds = array<i64: 1>, scalar_prefetch = 0 : i64, scratch_operands = 0 : i64, tpu.core_type = #tpu.core_type<tc>, window_params = [{pipeline_mode = #tpu.pipeline_mode<synchronous>, transform_indices = @transform_0, window_bounds = array<i64: 16, 1>}, {pipeline_mode = #tpu.pipeline_mode<synchronous>, transform_indices = @transform_1, window_bounds = array<i64: 2, 8>}, {pipeline_mode = #tpu.pipeline_mode<synchronous>, transform_indices = @transform_2, window_bounds = array<i64: 128, 32>}, {pipeline_mode = #tpu.pipeline_mode<synchronous>, transform_indices = @transform_3, window_bounds = array<i64: 8, 32>}, {pipeline_mode = #tpu.pipeline_mode<synchronous>, transform_indices = @transform_4, window_bounds = array<i64: 1, 32>}, {pipeline_mode = #tpu.pipeline_mode<synchronous>, transform_indices = @transform_5, window_bounds = array<i64: 1, 32>}, {pipeline_mode = #tpu.pipeline_mode<synchronous>, transform_indices = @transform_6, window_bounds = array<i64: 2, 32, 96>}, {pipeline_mode = #tpu.pipeline_mode<synchronous>, transform_indices = @transform_7, window_bounds = array<i64: 2, 1, 96>}, {pipeline_mode = #tpu.pipeline_mode<synchronous>, transform_indices = @transform_8, window_bounds = array<i64: 2, 32, 32>}, {pipeline_mode = #tpu.pipeline_mode<synchronous>, transform_indices = @transform_9, window_bounds = array<i64: 2, 1, 32>}, {pipeline_mode = #tpu.pipeline_mode<synchronous>, transform_indices = @transform_10, window_bounds = array<i64: 2, 1, 32>}, {pipeline_mode = #tpu.pipeline_mode<synchronous>, transform_indices = @transform_11, window_bounds = array<i64: 2, 1, 32>}, {pipeline_mode = #tpu.pipeline_mode<synchronous>, transform_indices = @transform_12, window_bounds = array<i64: 2, 32, 64>}, {pipeline_mode = #tpu.pipeline_mode<synchronous>, transform_indices = @transform_13, window_bounds = array<i64: 2, 1, 64>}, {pipeline_mode = #tpu.pipeline_mode<synchronous>, transform_indices = @transform_14, window_bounds = array<i64: 2, 64, 32>}, {pipeline_mode = #tpu.pipeline_mode<synchronous>, transform_indices = @transform_15, window_bounds = array<i64: 2, 1, 32>}, {pipeline_mode = #tpu.pipeline_mode<synchronous>, transform_indices = @transform_16, window_bounds = array<i64: 2, 1, 32>}, {pipeline_mode = #tpu.pipeline_mode<synchronous>, transform_indices = @transform_17, window_bounds = array<i64: 2, 1, 32>}, {pipeline_mode = #tpu.pipeline_mode<synchronous>, transform_indices = @transform_18, window_bounds = array<i64: 32, 128>}, {pipeline_mode = #tpu.pipeline_mode<synchronous>, transform_indices = @transform_19, window_bounds = array<i64: 1, 128>}, {pipeline_mode = #tpu.pipeline_mode<synchronous>, transform_indices = @transform_20, window_bounds = array<i64: 16, 128>}, {pipeline_mode = #tpu.pipeline_mode<synchronous>, transform_indices = @transform_21, window_bounds = array<i64: 16, 128>}]} {
    %c0 = arith.constant 0 : index
    %c0_0 = arith.constant 0 : index
    %0 = vector.load %arg1[%c0, %c0_0] : memref<16x1xi32, #tpu.memory_space<vmem>>, vector<16x1xi32>
    %1 = tpu.iota {dimensions = array<i32: 1>} : vector<16x128xi32>
    %2 = vector.broadcast %0 : vector<16x1xi32> to vector<16x128xi32>
    %3 = arith.cmpi eq, %2, %1 : vector<16x128xi32>
    %4 = arith.extui %3 : vector<16x128xi1> to vector<16x128xi32>
    %5 = arith.sitofp %4 : vector<16x128xi32> to vector<16x128xf32>
    %c0_1 = arith.constant 0 : index
    %c0_2 = arith.constant 0 : index
    %6 = vector.load %arg3[%c0_1, %c0_2] : memref<128x32xf32, #tpu.memory_space<vmem>>, vector<128x32xf32>
    %cst = arith.constant dense<0.000000e+00> : vector<16x32xf32>
    %7 = tpu.matmul %5, %6, %cst {dimension_numbers = #tpu.dot_dimension_numbers<[1], [0], [0], [1], [0, 0, 1, 1], [], []>} : vector<16x128xf32>, vector<128x32xf32>, vector<16x32xf32> -> vector<16x32xf32>
    %8 = vector.shape_cast %7 : vector<16x32xf32> to vector<2x8x32xf32>
    %c0_3 = arith.constant 0 : index
    %c0_4 = arith.constant 0 : index
    %9 = vector.load %arg4[%c0_3, %c0_4] : memref<8x32xf32, #tpu.memory_space<vmem>>, vector<8x32xf32>
    %10 = vector.shape_cast %9 : vector<8x32xf32> to vector<1x8x32xf32>
    %11 = vector.broadcast %10 : vector<1x8x32xf32> to vector<2x8x32xf32>
    %12 = arith.addf %8, %11 : vector<2x8x32xf32>
    %13 = vector.shape_cast %12 : vector<2x8x32xf32> to vector<16x32xf32>
    %c0_5 = arith.constant 0 : index
    %c0_6 = arith.constant 0 : index
    %14 = vector.load %arg5[%c0_5, %c0_6] : memref<1x32xf32, #tpu.memory_space<vmem>>, vector<1x32xf32>
    %c0_7 = arith.constant 0 : index
    %c0_8 = arith.constant 0 : index
    %15 = vector.load %arg6[%c0_7, %c0_8] : memref<1x32xf32, #tpu.memory_space<vmem>>, vector<1x32xf32>
    %cst_9 = arith.constant dense<0.000000e+00> : vector<16xf32>
    %16 = vector.multi_reduction <add>, %13, %cst_9 [1] : vector<16x32xf32> to vector<16xf32>
    %17 = vector.shape_cast %16 : vector<16xf32> to vector<16x1xf32>
    %cst_10 = arith.constant 3.200000e+01 : f32
    %18 = vector.broadcast %cst_10 : f32 to vector<16x1xf32>
    %19 = arith.divf %17, %18 : vector<16x1xf32>
    %20 = arith.mulf %13, %13 : vector<16x32xf32>
    %cst_11 = arith.constant dense<0.000000e+00> : vector<16xf32>
    %21 = vector.multi_reduction <add>, %20, %cst_11 [1] : vector<16x32xf32> to vector<16xf32>
    %22 = vector.shape_cast %21 : vector<16xf32> to vector<16x1xf32>
    %cst_12 = arith.constant 3.200000e+01 : f32
    %23 = vector.broadcast %cst_12 : f32 to vector<16x1xf32>
    %24 = arith.divf %22, %23 : vector<16x1xf32>
    %25 = arith.mulf %19, %19 : vector<16x1xf32>
    %26 = arith.subf %24, %25 : vector<16x1xf32>
    %cst_13 = arith.constant 0.000000e+00 : f32
    %27 = vector.broadcast %cst_13 : f32 to vector<16x1xf32>
    %28 = arith.maximumf %26, %27 : vector<16x1xf32>
    %29 = vector.broadcast %19 : vector<16x1xf32> to vector<16x32xf32>
    %30 = arith.subf %13, %29 : vector<16x32xf32>
    %cst_14 = arith.constant 9.99999996E-13 : f32
    %31 = vector.broadcast %cst_14 : f32 to vector<16x1xf32>
    %32 = arith.addf %28, %31 : vector<16x1xf32>
    %33 = math.rsqrt %32 : vector<16x1xf32>
    %34 = vector.broadcast %33 : vector<16x1xf32> to vector<16x32xf32>
    %35 = arith.mulf %30, %34 : vector<16x32xf32>
    %36 = vector.broadcast %14 : vector<1x32xf32> to vector<16x32xf32>
    %37 = arith.mulf %35, %36 : vector<16x32xf32>
    %38 = vector.broadcast %15 : vector<1x32xf32> to vector<16x32xf32>
    %39 = arith.addf %37, %38 : vector<16x32xf32>
    %c0_15 = arith.constant 0 : index
    %c0_16 = arith.constant 0 : index
    %40 = vector.load %arg2[%c0_15, %c0_16] : memref<2x8xf32, #tpu.memory_space<vmem>>, vector<2x8xf32>
    %41 = vector.shape_cast %40 : vector<2x8xf32> to vector<2x1x8xf32>
    %42 = tpu.concatenate %41, %41 in 0 : vector<2x1x8xf32>, vector<2x1x8xf32> -> vector<4x1x8xf32>
    %43 = arith.truncf %39 : vector<16x32xf32> to vector<16x32xbf16>
    %c0_17 = arith.constant 0 : index
    %c0_18 = arith.constant 0 : index
    %c0_19 = arith.constant 0 : index
    %44 = vector.load %arg7[%c0_17, %c0_18, %c0_19] : memref<2x32x96xbf16, #tpu.memory_space<vmem>>, vector<1x32x96xbf16>
    %45 = vector.shape_cast %44 : vector<1x32x96xbf16> to vector<32x96xbf16>
    %cst_20 = arith.constant dense<0.000000e+00> : vector<16x96xf32>
    %46 = tpu.matmul %43, %45, %cst_20 {dimension_numbers = #tpu.dot_dimension_numbers<[1], [0], [0], [1], [0, 0, 1, 1], [], []>} : vector<16x32xbf16>, vector<32x96xbf16>, vector<16x96xf32> -> vector<16x96xf32>
    %c0_21 = arith.constant 0 : index
    %c0_22 = arith.constant 0 : index
    %c0_23 = arith.constant 0 : index
    %47 = vector.load %arg8[%c0_21, %c0_22, %c0_23] : memref<2x1x96xf32, #tpu.memory_space<vmem>>, vector<1x1x96xf32>
    %48 = vector.shape_cast %47 : vector<1x1x96xf32> to vector<1x96xf32>
    %49 = vector.broadcast %48 : vector<1x96xf32> to vector<16x96xf32>
    %50 = arith.addf %46, %49 : vector<16x96xf32>
    %51 = arith.truncf %50 : vector<16x96xf32> to vector<16x96xbf16>
    %52 = vector.extract_strided_slice %51 {offsets = [0, 0], sizes = [16, 16], strides = [1, 1]} : vector<16x96xbf16> to vector<16x16xbf16>
    %53 = vector.extract_strided_slice %51 {offsets = [0, 16], sizes = [16, 16], strides = [1, 1]} : vector<16x96xbf16> to vector<16x16xbf16>
    %54 = tpu.concatenate %52, %53 in 0 : vector<16x16xbf16>, vector<16x16xbf16> -> vector<32x16xbf16>
    %55 = vector.shape_cast %54 : vector<32x16xbf16> to vector<4x8x16xbf16>
    %56 = vector.extract_strided_slice %51 {offsets = [0, 32], sizes = [16, 16], strides = [1, 1]} : vector<16x96xbf16> to vector<16x16xbf16>
    %57 = vector.extract_strided_slice %51 {offsets = [0, 48], sizes = [16, 16], strides = [1, 1]} : vector<16x96xbf16> to vector<16x16xbf16>
    %58 = tpu.concatenate %56, %57 in 0 : vector<16x16xbf16>, vector<16x16xbf16> -> vector<32x16xbf16>
    %59 = vector.shape_cast %58 : vector<32x16xbf16> to vector<4x8x16xbf16>
    %60 = vector.extract_strided_slice %51 {offsets = [0, 64], sizes = [16, 16], strides = [1, 1]} : vector<16x96xbf16> to vector<16x16xbf16>
    %61 = vector.extract_strided_slice %51 {offsets = [0, 80], sizes = [16, 16], strides = [1, 1]} : vector<16x96xbf16> to vector<16x16xbf16>
    %62 = tpu.concatenate %60, %61 in 0 : vector<16x16xbf16>, vector<16x16xbf16> -> vector<32x16xbf16>
    %63 = vector.shape_cast %62 : vector<32x16xbf16> to vector<4x8x16xbf16>
    "tpu.trace_start"() <{level = 10 : i32, message = "bqd,bkd->bqk"}> : () -> ()
    %cst_24 = arith.constant dense<0.000000e+00> : vector<4x8x8xf32>
    %64 = tpu.matmul %55, %59, %cst_24 {dimension_numbers = #tpu.dot_dimension_numbers<[2], [2], [1], [1], [0, 0, 0, 1, 1, 1], [0], [0]>} : vector<4x8x16xbf16>, vector<4x8x16xbf16>, vector<4x8x8xf32> -> vector<4x8x8xf32>
    "tpu.trace_stop"() : () -> ()
    %cst_25 = arith.constant 2.500000e-01 : f32
    %65 = vector.broadcast %cst_25 : f32 to vector<4x8x8xf32>
    %66 = arith.mulf %64, %65 : vector<4x8x8xf32>
    %67 = vector.broadcast %42 : vector<4x1x8xf32> to vector<4x8x8xf32>
    %68 = arith.addf %66, %67 : vector<4x8x8xf32>
    %cst_26 = arith.constant dense<0xFF800000> : vector<4x8xf32>
    %69 = vector.multi_reduction <maximumf>, %68, %cst_26 [2] : vector<4x8x8xf32> to vector<4x8xf32>
    %70 = vector.shape_cast %69 : vector<4x8xf32> to vector<4x8x1xf32>
    %71 = vector.broadcast %70 : vector<4x8x1xf32> to vector<4x8x8xf32>
    %72 = arith.subf %68, %71 : vector<4x8x8xf32>
    %73 = math.exp %72 : vector<4x8x8xf32>
    %cst_27 = arith.constant dense<0.000000e+00> : vector<4x8xf32>
    %74 = vector.multi_reduction <add>, %73, %cst_27 [2] : vector<4x8x8xf32> to vector<4x8xf32>
    %75 = vector.shape_cast %74 : vector<4x8xf32> to vector<4x8x1xf32>
    %76 = tpu.reciprocal %75 {approx = true} : vector<4x8x1xf32> -> vector<4x8x1xf32>
    %77 = vector.broadcast %76 : vector<4x8x1xf32> to vector<4x8x8xf32>
    %78 = arith.mulf %73, %77 : vector<4x8x8xf32>
    %79 = arith.truncf %78 : vector<4x8x8xf32> to vector<4x8x8xbf16>
    "tpu.trace_start"() <{level = 10 : i32, message = "bqk,bkd->bqd"}> : () -> ()
    %cst_28 = arith.constant dense<0.000000e+00> : vector<4x8x16xf32>
    %80 = tpu.matmul %79, %63, %cst_28 {dimension_numbers = #tpu.dot_dimension_numbers<[2], [1], [1], [2], [0, 0, 0, 1, 1, 2], [0], [0]>} : vector<4x8x8xbf16>, vector<4x8x16xbf16>, vector<4x8x16xf32> -> vector<4x8x16xf32>
    "tpu.trace_stop"() : () -> ()
    %81 = vector.shape_cast %80 : vector<4x8x16xf32> to vector<2x16x16xf32>
    %82 = vector.extract_strided_slice %81 {offsets = [0, 0, 0], sizes = [1, 16, 16], strides = [1, 1, 1]} : vector<2x16x16xf32> to vector<1x16x16xf32>
    %83 = vector.shape_cast %82 : vector<1x16x16xf32> to vector<16x16xf32>
    %84 = vector.extract_strided_slice %81 {offsets = [1, 0, 0], sizes = [1, 16, 16], strides = [1, 1, 1]} : vector<2x16x16xf32> to vector<1x16x16xf32>
    %85 = vector.shape_cast %84 : vector<1x16x16xf32> to vector<16x16xf32>
    %86 = tpu.concatenate %83, %85 in 1 : vector<16x16xf32>, vector<16x16xf32> -> vector<16x32xf32>
    %87 = arith.truncf %86 : vector<16x32xf32> to vector<16x32xbf16>
    %c0_29 = arith.constant 0 : index
    %c0_30 = arith.constant 0 : index
    %c0_31 = arith.constant 0 : index
    %88 = vector.load %arg9[%c0_29, %c0_30, %c0_31] : memref<2x32x32xbf16, #tpu.memory_space<vmem>>, vector<1x32x32xbf16>
    %89 = vector.shape_cast %88 : vector<1x32x32xbf16> to vector<32x32xbf16>
    %cst_32 = arith.constant dense<0.000000e+00> : vector<16x32xf32>
    %90 = tpu.matmul %87, %89, %cst_32 {dimension_numbers = #tpu.dot_dimension_numbers<[1], [0], [0], [1], [0, 0, 1, 1], [], []>} : vector<16x32xbf16>, vector<32x32xbf16>, vector<16x32xf32> -> vector<16x32xf32>
    %c0_33 = arith.constant 0 : index
    %c0_34 = arith.constant 0 : index
    %c0_35 = arith.constant 0 : index
    %91 = vector.load %arg10[%c0_33, %c0_34, %c0_35] : memref<2x1x32xf32, #tpu.memory_space<vmem>>, vector<1x1x32xf32>
    %92 = vector.shape_cast %91 : vector<1x1x32xf32> to vector<1x32xf32>
    %93 = vector.broadcast %92 : vector<1x32xf32> to vector<16x32xf32>
    %94 = arith.addf %90, %93 : vector<16x32xf32>
    %95 = arith.addf %94, %39 : vector<16x32xf32>
    %c0_36 = arith.constant 0 : index
    %c0_37 = arith.constant 0 : index
    %c0_38 = arith.constant 0 : index
    %96 = vector.load %arg11[%c0_36, %c0_37, %c0_38] : memref<2x1x32xf32, #tpu.memory_space<vmem>>, vector<1x1x32xf32>
    %97 = vector.shape_cast %96 : vector<1x1x32xf32> to vector<1x32xf32>
    %c0_39 = arith.constant 0 : index
    %c0_40 = arith.constant 0 : index
    %c0_41 = arith.constant 0 : index
    %98 = vector.load %arg12[%c0_39, %c0_40, %c0_41] : memref<2x1x32xf32, #tpu.memory_space<vmem>>, vector<1x1x32xf32>
    %99 = vector.shape_cast %98 : vector<1x1x32xf32> to vector<1x32xf32>
    %cst_42 = arith.constant dense<0.000000e+00> : vector<16xf32>
    %100 = vector.multi_reduction <add>, %95, %cst_42 [1] : vector<16x32xf32> to vector<16xf32>
    %101 = vector.shape_cast %100 : vector<16xf32> to vector<16x1xf32>
    %cst_43 = arith.constant 3.200000e+01 : f32
    %102 = vector.broadcast %cst_43 : f32 to vector<16x1xf32>
    %103 = arith.divf %101, %102 : vector<16x1xf32>
    %104 = arith.mulf %95, %95 : vector<16x32xf32>
    %cst_44 = arith.constant dense<0.000000e+00> : vector<16xf32>
    %105 = vector.multi_reduction <add>, %104, %cst_44 [1] : vector<16x32xf32> to vector<16xf32>
    %106 = vector.shape_cast %105 : vector<16xf32> to vector<16x1xf32>
    %cst_45 = arith.constant 3.200000e+01 : f32
    %107 = vector.broadcast %cst_45 : f32 to vector<16x1xf32>
    %108 = arith.divf %106, %107 : vector<16x1xf32>
    %109 = arith.mulf %103, %103 : vector<16x1xf32>
    %110 = arith.subf %108, %109 : vector<16x1xf32>
    %cst_46 = arith.constant 0.000000e+00 : f32
    %111 = vector.broadcast %cst_46 : f32 to vector<16x1xf32>
    %112 = arith.maximumf %110, %111 : vector<16x1xf32>
    %113 = vector.broadcast %103 : vector<16x1xf32> to vector<16x32xf32>
    %114 = arith.subf %95, %113 : vector<16x32xf32>
    %cst_47 = arith.constant 9.99999996E-13 : f32
    %115 = vector.broadcast %cst_47 : f32 to vector<16x1xf32>
    %116 = arith.addf %112, %115 : vector<16x1xf32>
    %117 = math.rsqrt %116 : vector<16x1xf32>
    %118 = vector.broadcast %117 : vector<16x1xf32> to vector<16x32xf32>
    %119 = arith.mulf %114, %118 : vector<16x32xf32>
    %120 = vector.broadcast %97 : vector<1x32xf32> to vector<16x32xf32>
    %121 = arith.mulf %119, %120 : vector<16x32xf32>
    %122 = vector.broadcast %99 : vector<1x32xf32> to vector<16x32xf32>
    %123 = arith.addf %121, %122 : vector<16x32xf32>
    %124 = arith.truncf %123 : vector<16x32xf32> to vector<16x32xbf16>
    %c0_48 = arith.constant 0 : index
    %c0_49 = arith.constant 0 : index
    %c0_50 = arith.constant 0 : index
    %125 = vector.load %arg13[%c0_48, %c0_49, %c0_50] : memref<2x32x64xbf16, #tpu.memory_space<vmem>>, vector<1x32x64xbf16>
    %126 = vector.shape_cast %125 : vector<1x32x64xbf16> to vector<32x64xbf16>
    %cst_51 = arith.constant dense<0.000000e+00> : vector<16x64xf32>
    %127 = tpu.matmul %124, %126, %cst_51 {dimension_numbers = #tpu.dot_dimension_numbers<[1], [0], [0], [1], [0, 0, 1, 1], [], []>} : vector<16x32xbf16>, vector<32x64xbf16>, vector<16x64xf32> -> vector<16x64xf32>
    %c0_52 = arith.constant 0 : index
    %c0_53 = arith.constant 0 : index
    %c0_54 = arith.constant 0 : index
    %128 = vector.load %arg14[%c0_52, %c0_53, %c0_54] : memref<2x1x64xf32, #tpu.memory_space<vmem>>, vector<1x1x64xf32>
    %129 = vector.shape_cast %128 : vector<1x1x64xf32> to vector<1x64xf32>
    %130 = vector.broadcast %129 : vector<1x64xf32> to vector<16x64xf32>
    %131 = arith.addf %127, %130 : vector<16x64xf32>
    %cst_55 = arith.constant 5.000000e-01 : f32
    %132 = vector.broadcast %cst_55 : f32 to vector<16x64xf32>
    %133 = arith.mulf %132, %131 : vector<16x64xf32>
    %cst_56 = arith.constant 4.471500e-02 : f32
    %134 = vector.broadcast %cst_56 : f32 to vector<16x64xf32>
    %135 = arith.mulf %134, %131 : vector<16x64xf32>
    %136 = arith.mulf %135, %131 : vector<16x64xf32>
    %137 = arith.mulf %136, %131 : vector<16x64xf32>
    %138 = arith.addf %131, %137 : vector<16x64xf32>
    %cst_57 = arith.constant 0.797884583 : f32
    %139 = vector.broadcast %cst_57 : f32 to vector<16x64xf32>
    %140 = arith.mulf %139, %138 : vector<16x64xf32>
    %141 = math.tanh %140 : vector<16x64xf32>
    %cst_58 = arith.constant 1.000000e+00 : f32
    %142 = vector.broadcast %cst_58 : f32 to vector<16x64xf32>
    %143 = arith.addf %142, %141 : vector<16x64xf32>
    %144 = arith.mulf %133, %143 : vector<16x64xf32>
    %145 = arith.truncf %144 : vector<16x64xf32> to vector<16x64xbf16>
    %c0_59 = arith.constant 0 : index
    %c0_60 = arith.constant 0 : index
    %c0_61 = arith.constant 0 : index
    %146 = vector.load %arg15[%c0_59, %c0_60, %c0_61] : memref<2x64x32xbf16, #tpu.memory_space<vmem>>, vector<1x64x32xbf16>
    %147 = vector.shape_cast %146 : vector<1x64x32xbf16> to vector<64x32xbf16>
    %cst_62 = arith.constant dense<0.000000e+00> : vector<16x32xf32>
    %148 = tpu.matmul %145, %147, %cst_62 {dimension_numbers = #tpu.dot_dimension_numbers<[1], [0], [0], [1], [0, 0, 1, 1], [], []>} : vector<16x64xbf16>, vector<64x32xbf16>, vector<16x32xf32> -> vector<16x32xf32>
    %c0_63 = arith.constant 0 : index
    %c0_64 = arith.constant 0 : index
    %c0_65 = arith.constant 0 : index
    %149 = vector.load %arg16[%c0_63, %c0_64, %c0_65] : memref<2x1x32xf32, #tpu.memory_space<vmem>>, vector<1x1x32xf32>
    %150 = vector.shape_cast %149 : vector<1x1x32xf32> to vector<1x32xf32>
    %151 = vector.broadcast %150 : vector<1x32xf32> to vector<16x32xf32>
    %152 = arith.addf %148, %151 : vector<16x32xf32>
    %153 = arith.addf %152, %123 : vector<16x32xf32>
    %c0_66 = arith.constant 0 : index
    %c0_67 = arith.constant 0 : index
    %c0_68 = arith.constant 0 : index
    %154 = vector.load %arg17[%c0_66, %c0_67, %c0_68] : memref<2x1x32xf32, #tpu.memory_space<vmem>>, vector<1x1x32xf32>
    %155 = vector.shape_cast %154 : vector<1x1x32xf32> to vector<1x32xf32>
    %c0_69 = arith.constant 0 : index
    %c0_70 = arith.constant 0 : index
    %c0_71 = arith.constant 0 : index
    %156 = vector.load %arg18[%c0_69, %c0_70, %c0_71] : memref<2x1x32xf32, #tpu.memory_space<vmem>>, vector<1x1x32xf32>
    %157 = vector.shape_cast %156 : vector<1x1x32xf32> to vector<1x32xf32>
    %cst_72 = arith.constant dense<0.000000e+00> : vector<16xf32>
    %158 = vector.multi_reduction <add>, %153, %cst_72 [1] : vector<16x32xf32> to vector<16xf32>
    %159 = vector.shape_cast %158 : vector<16xf32> to vector<16x1xf32>
    %cst_73 = arith.constant 3.200000e+01 : f32
    %160 = vector.broadcast %cst_73 : f32 to vector<16x1xf32>
    %161 = arith.divf %159, %160 : vector<16x1xf32>
    %162 = arith.mulf %153, %153 : vector<16x32xf32>
    %cst_74 = arith.constant dense<0.000000e+00> : vector<16xf32>
    %163 = vector.multi_reduction <add>, %162, %cst_74 [1] : vector<16x32xf32> to vector<16xf32>
    %164 = vector.shape_cast %163 : vector<16xf32> to vector<16x1xf32>
    %cst_75 = arith.constant 3.200000e+01 : f32
    %165 = vector.broadcast %cst_75 : f32 to vector<16x1xf32>
    %166 = arith.divf %164, %165 : vector<16x1xf32>
    %167 = arith.mulf %161, %161 : vector<16x1xf32>
    %168 = arith.subf %166, %167 : vector<16x1xf32>
    %cst_76 = arith.constant 0.000000e+00 : f32
    %169 = vector.broadcast %cst_76 : f32 to vector<16x1xf32>
    %170 = arith.maximumf %168, %169 : vector<16x1xf32>
    %171 = vector.broadcast %161 : vector<16x1xf32> to vector<16x32xf32>
    %172 = arith.subf %153, %171 : vector<16x32xf32>
    %cst_77 = arith.constant 9.99999996E-13 : f32
    %173 = vector.broadcast %cst_77 : f32 to vector<16x1xf32>
    %174 = arith.addf %170, %173 : vector<16x1xf32>
    %175 = math.rsqrt %174 : vector<16x1xf32>
    %176 = vector.broadcast %175 : vector<16x1xf32> to vector<16x32xf32>
    %177 = arith.mulf %172, %176 : vector<16x32xf32>
    %178 = vector.broadcast %155 : vector<1x32xf32> to vector<16x32xf32>
    %179 = arith.mulf %177, %178 : vector<16x32xf32>
    %180 = vector.broadcast %157 : vector<1x32xf32> to vector<16x32xf32>
    %181 = arith.addf %179, %180 : vector<16x32xf32>
    %182 = arith.truncf %181 : vector<16x32xf32> to vector<16x32xbf16>
    %c1 = arith.constant 1 : index
    %c0_78 = arith.constant 0 : index
    %c0_79 = arith.constant 0 : index
    %183 = vector.load %arg7[%c1, %c0_78, %c0_79] : memref<2x32x96xbf16, #tpu.memory_space<vmem>>, vector<1x32x96xbf16>
    %184 = vector.shape_cast %183 : vector<1x32x96xbf16> to vector<32x96xbf16>
    %cst_80 = arith.constant dense<0.000000e+00> : vector<16x96xf32>
    %185 = tpu.matmul %182, %184, %cst_80 {dimension_numbers = #tpu.dot_dimension_numbers<[1], [0], [0], [1], [0, 0, 1, 1], [], []>} : vector<16x32xbf16>, vector<32x96xbf16>, vector<16x96xf32> -> vector<16x96xf32>
    %c1_81 = arith.constant 1 : index
    %c0_82 = arith.constant 0 : index
    %c0_83 = arith.constant 0 : index
    %186 = vector.load %arg8[%c1_81, %c0_82, %c0_83] : memref<2x1x96xf32, #tpu.memory_space<vmem>>, vector<1x1x96xf32>
    %187 = vector.shape_cast %186 : vector<1x1x96xf32> to vector<1x96xf32>
    %188 = vector.broadcast %187 : vector<1x96xf32> to vector<16x96xf32>
    %189 = arith.addf %185, %188 : vector<16x96xf32>
    %190 = arith.truncf %189 : vector<16x96xf32> to vector<16x96xbf16>
    %191 = vector.extract_strided_slice %190 {offsets = [0, 0], sizes = [16, 16], strides = [1, 1]} : vector<16x96xbf16> to vector<16x16xbf16>
    %192 = vector.extract_strided_slice %190 {offsets = [0, 16], sizes = [16, 16], strides = [1, 1]} : vector<16x96xbf16> to vector<16x16xbf16>
    %193 = tpu.concatenate %191, %192 in 0 : vector<16x16xbf16>, vector<16x16xbf16> -> vector<32x16xbf16>
    %194 = vector.shape_cast %193 : vector<32x16xbf16> to vector<4x8x16xbf16>
    %195 = vector.extract_strided_slice %190 {offsets = [0, 32], sizes = [16, 16], strides = [1, 1]} : vector<16x96xbf16> to vector<16x16xbf16>
    %196 = vector.extract_strided_slice %190 {offsets = [0, 48], sizes = [16, 16], strides = [1, 1]} : vector<16x96xbf16> to vector<16x16xbf16>
    %197 = tpu.concatenate %195, %196 in 0 : vector<16x16xbf16>, vector<16x16xbf16> -> vector<32x16xbf16>
    %198 = vector.shape_cast %197 : vector<32x16xbf16> to vector<4x8x16xbf16>
    %199 = vector.extract_strided_slice %190 {offsets = [0, 64], sizes = [16, 16], strides = [1, 1]} : vector<16x96xbf16> to vector<16x16xbf16>
    %200 = vector.extract_strided_slice %190 {offsets = [0, 80], sizes = [16, 16], strides = [1, 1]} : vector<16x96xbf16> to vector<16x16xbf16>
    %201 = tpu.concatenate %199, %200 in 0 : vector<16x16xbf16>, vector<16x16xbf16> -> vector<32x16xbf16>
    %202 = vector.shape_cast %201 : vector<32x16xbf16> to vector<4x8x16xbf16>
    "tpu.trace_start"() <{level = 10 : i32, message = "bqd,bkd->bqk"}> : () -> ()
    %cst_84 = arith.constant dense<0.000000e+00> : vector<4x8x8xf32>
    %203 = tpu.matmul %194, %198, %cst_84 {dimension_numbers = #tpu.dot_dimension_numbers<[2], [2], [1], [1], [0, 0, 0, 1, 1, 1], [0], [0]>} : vector<4x8x16xbf16>, vector<4x8x16xbf16>, vector<4x8x8xf32> -> vector<4x8x8xf32>
    "tpu.trace_stop"() : () -> ()
    %cst_85 = arith.constant 2.500000e-01 : f32
    %204 = vector.broadcast %cst_85 : f32 to vector<4x8x8xf32>
    %205 = arith.mulf %203, %204 : vector<4x8x8xf32>
    %206 = vector.broadcast %42 : vector<4x1x8xf32> to vector<4x8x8xf32>
    %207 = arith.addf %205, %206 : vector<4x8x8xf32>
    %cst_86 = arith.constant dense<0xFF800000> : vector<4x8xf32>
    %208 = vector.multi_reduction <maximumf>, %207, %cst_86 [2] : vector<4x8x8xf32> to vector<4x8xf32>
    %209 = vector.shape_cast %208 : vector<4x8xf32> to vector<4x8x1xf32>
    %210 = vector.broadcast %209 : vector<4x8x1xf32> to vector<4x8x8xf32>
    %211 = arith.subf %207, %210 : vector<4x8x8xf32>
    %212 = math.exp %211 : vector<4x8x8xf32>
    %cst_87 = arith.constant dense<0.000000e+00> : vector<4x8xf32>
    %213 = vector.multi_reduction <add>, %212, %cst_87 [2] : vector<4x8x8xf32> to vector<4x8xf32>
    %214 = vector.shape_cast %213 : vector<4x8xf32> to vector<4x8x1xf32>
    %215 = tpu.reciprocal %214 {approx = true} : vector<4x8x1xf32> -> vector<4x8x1xf32>
    %216 = vector.broadcast %215 : vector<4x8x1xf32> to vector<4x8x8xf32>
    %217 = arith.mulf %212, %216 : vector<4x8x8xf32>
    %218 = arith.truncf %217 : vector<4x8x8xf32> to vector<4x8x8xbf16>
    "tpu.trace_start"() <{level = 10 : i32, message = "bqk,bkd->bqd"}> : () -> ()
    %cst_88 = arith.constant dense<0.000000e+00> : vector<4x8x16xf32>
    %219 = tpu.matmul %218, %202, %cst_88 {dimension_numbers = #tpu.dot_dimension_numbers<[2], [1], [1], [2], [0, 0, 0, 1, 1, 2], [0], [0]>} : vector<4x8x8xbf16>, vector<4x8x16xbf16>, vector<4x8x16xf32> -> vector<4x8x16xf32>
    "tpu.trace_stop"() : () -> ()
    %220 = vector.shape_cast %219 : vector<4x8x16xf32> to vector<2x16x16xf32>
    %221 = vector.extract_strided_slice %220 {offsets = [0, 0, 0], sizes = [1, 16, 16], strides = [1, 1, 1]} : vector<2x16x16xf32> to vector<1x16x16xf32>
    %222 = vector.shape_cast %221 : vector<1x16x16xf32> to vector<16x16xf32>
    %223 = vector.extract_strided_slice %220 {offsets = [1, 0, 0], sizes = [1, 16, 16], strides = [1, 1, 1]} : vector<2x16x16xf32> to vector<1x16x16xf32>
    %224 = vector.shape_cast %223 : vector<1x16x16xf32> to vector<16x16xf32>
    %225 = tpu.concatenate %222, %224 in 1 : vector<16x16xf32>, vector<16x16xf32> -> vector<16x32xf32>
    %226 = arith.truncf %225 : vector<16x32xf32> to vector<16x32xbf16>
    %c1_89 = arith.constant 1 : index
    %c0_90 = arith.constant 0 : index
    %c0_91 = arith.constant 0 : index
    %227 = vector.load %arg9[%c1_89, %c0_90, %c0_91] : memref<2x32x32xbf16, #tpu.memory_space<vmem>>, vector<1x32x32xbf16>
    %228 = vector.shape_cast %227 : vector<1x32x32xbf16> to vector<32x32xbf16>
    %cst_92 = arith.constant dense<0.000000e+00> : vector<16x32xf32>
    %229 = tpu.matmul %226, %228, %cst_92 {dimension_numbers = #tpu.dot_dimension_numbers<[1], [0], [0], [1], [0, 0, 1, 1], [], []>} : vector<16x32xbf16>, vector<32x32xbf16>, vector<16x32xf32> -> vector<16x32xf32>
    %c1_93 = arith.constant 1 : index
    %c0_94 = arith.constant 0 : index
    %c0_95 = arith.constant 0 : index
    %230 = vector.load %arg10[%c1_93, %c0_94, %c0_95] : memref<2x1x32xf32, #tpu.memory_space<vmem>>, vector<1x1x32xf32>
    %231 = vector.shape_cast %230 : vector<1x1x32xf32> to vector<1x32xf32>
    %232 = vector.broadcast %231 : vector<1x32xf32> to vector<16x32xf32>
    %233 = arith.addf %229, %232 : vector<16x32xf32>
    %234 = arith.addf %233, %181 : vector<16x32xf32>
    %c1_96 = arith.constant 1 : index
    %c0_97 = arith.constant 0 : index
    %c0_98 = arith.constant 0 : index
    %235 = vector.load %arg11[%c1_96, %c0_97, %c0_98] : memref<2x1x32xf32, #tpu.memory_space<vmem>>, vector<1x1x32xf32>
    %236 = vector.shape_cast %235 : vector<1x1x32xf32> to vector<1x32xf32>
    %c1_99 = arith.constant 1 : index
    %c0_100 = arith.constant 0 : index
    %c0_101 = arith.constant 0 : index
    %237 = vector.load %arg12[%c1_99, %c0_100, %c0_101] : memref<2x1x32xf32, #tpu.memory_space<vmem>>, vector<1x1x32xf32>
    %238 = vector.shape_cast %237 : vector<1x1x32xf32> to vector<1x32xf32>
    %cst_102 = arith.constant dense<0.000000e+00> : vector<16xf32>
    %239 = vector.multi_reduction <add>, %234, %cst_102 [1] : vector<16x32xf32> to vector<16xf32>
    %240 = vector.shape_cast %239 : vector<16xf32> to vector<16x1xf32>
    %cst_103 = arith.constant 3.200000e+01 : f32
    %241 = vector.broadcast %cst_103 : f32 to vector<16x1xf32>
    %242 = arith.divf %240, %241 : vector<16x1xf32>
    %243 = arith.mulf %234, %234 : vector<16x32xf32>
    %cst_104 = arith.constant dense<0.000000e+00> : vector<16xf32>
    %244 = vector.multi_reduction <add>, %243, %cst_104 [1] : vector<16x32xf32> to vector<16xf32>
    %245 = vector.shape_cast %244 : vector<16xf32> to vector<16x1xf32>
    %cst_105 = arith.constant 3.200000e+01 : f32
    %246 = vector.broadcast %cst_105 : f32 to vector<16x1xf32>
    %247 = arith.divf %245, %246 : vector<16x1xf32>
    %248 = arith.mulf %242, %242 : vector<16x1xf32>
    %249 = arith.subf %247, %248 : vector<16x1xf32>
    %cst_106 = arith.constant 0.000000e+00 : f32
    %250 = vector.broadcast %cst_106 : f32 to vector<16x1xf32>
    %251 = arith.maximumf %249, %250 : vector<16x1xf32>
    %252 = vector.broadcast %242 : vector<16x1xf32> to vector<16x32xf32>
    %253 = arith.subf %234, %252 : vector<16x32xf32>
    %cst_107 = arith.constant 9.99999996E-13 : f32
    %254 = vector.broadcast %cst_107 : f32 to vector<16x1xf32>
    %255 = arith.addf %251, %254 : vector<16x1xf32>
    %256 = math.rsqrt %255 : vector<16x1xf32>
    %257 = vector.broadcast %256 : vector<16x1xf32> to vector<16x32xf32>
    %258 = arith.mulf %253, %257 : vector<16x32xf32>
    %259 = vector.broadcast %236 : vector<1x32xf32> to vector<16x32xf32>
    %260 = arith.mulf %258, %259 : vector<16x32xf32>
    %261 = vector.broadcast %238 : vector<1x32xf32> to vector<16x32xf32>
    %262 = arith.addf %260, %261 : vector<16x32xf32>
    %263 = arith.truncf %262 : vector<16x32xf32> to vector<16x32xbf16>
    %c1_108 = arith.constant 1 : index
    %c0_109 = arith.constant 0 : index
    %c0_110 = arith.constant 0 : index
    %264 = vector.load %arg13[%c1_108, %c0_109, %c0_110] : memref<2x32x64xbf16, #tpu.memory_space<vmem>>, vector<1x32x64xbf16>
    %265 = vector.shape_cast %264 : vector<1x32x64xbf16> to vector<32x64xbf16>
    %cst_111 = arith.constant dense<0.000000e+00> : vector<16x64xf32>
    %266 = tpu.matmul %263, %265, %cst_111 {dimension_numbers = #tpu.dot_dimension_numbers<[1], [0], [0], [1], [0, 0, 1, 1], [], []>} : vector<16x32xbf16>, vector<32x64xbf16>, vector<16x64xf32> -> vector<16x64xf32>
    %c1_112 = arith.constant 1 : index
    %c0_113 = arith.constant 0 : index
    %c0_114 = arith.constant 0 : index
    %267 = vector.load %arg14[%c1_112, %c0_113, %c0_114] : memref<2x1x64xf32, #tpu.memory_space<vmem>>, vector<1x1x64xf32>
    %268 = vector.shape_cast %267 : vector<1x1x64xf32> to vector<1x64xf32>
    %269 = vector.broadcast %268 : vector<1x64xf32> to vector<16x64xf32>
    %270 = arith.addf %266, %269 : vector<16x64xf32>
    %cst_115 = arith.constant 5.000000e-01 : f32
    %271 = vector.broadcast %cst_115 : f32 to vector<16x64xf32>
    %272 = arith.mulf %271, %270 : vector<16x64xf32>
    %cst_116 = arith.constant 4.471500e-02 : f32
    %273 = vector.broadcast %cst_116 : f32 to vector<16x64xf32>
    %274 = arith.mulf %273, %270 : vector<16x64xf32>
    %275 = arith.mulf %274, %270 : vector<16x64xf32>
    %276 = arith.mulf %275, %270 : vector<16x64xf32>
    %277 = arith.addf %270, %276 : vector<16x64xf32>
    %cst_117 = arith.constant 0.797884583 : f32
    %278 = vector.broadcast %cst_117 : f32 to vector<16x64xf32>
    %279 = arith.mulf %278, %277 : vector<16x64xf32>
    %280 = math.tanh %279 : vector<16x64xf32>
    %cst_118 = arith.constant 1.000000e+00 : f32
    %281 = vector.broadcast %cst_118 : f32 to vector<16x64xf32>
    %282 = arith.addf %281, %280 : vector<16x64xf32>
    %283 = arith.mulf %272, %282 : vector<16x64xf32>
    %284 = arith.truncf %283 : vector<16x64xf32> to vector<16x64xbf16>
    %c1_119 = arith.constant 1 : index
    %c0_120 = arith.constant 0 : index
    %c0_121 = arith.constant 0 : index
    %285 = vector.load %arg15[%c1_119, %c0_120, %c0_121] : memref<2x64x32xbf16, #tpu.memory_space<vmem>>, vector<1x64x32xbf16>
    %286 = vector.shape_cast %285 : vector<1x64x32xbf16> to vector<64x32xbf16>
    %cst_122 = arith.constant dense<0.000000e+00> : vector<16x32xf32>
    %287 = tpu.matmul %284, %286, %cst_122 {dimension_numbers = #tpu.dot_dimension_numbers<[1], [0], [0], [1], [0, 0, 1, 1], [], []>} : vector<16x64xbf16>, vector<64x32xbf16>, vector<16x32xf32> -> vector<16x32xf32>
    %c1_123 = arith.constant 1 : index
    %c0_124 = arith.constant 0 : index
    %c0_125 = arith.constant 0 : index
    %288 = vector.load %arg16[%c1_123, %c0_124, %c0_125] : memref<2x1x32xf32, #tpu.memory_space<vmem>>, vector<1x1x32xf32>
    %289 = vector.shape_cast %288 : vector<1x1x32xf32> to vector<1x32xf32>
    %290 = vector.broadcast %289 : vector<1x32xf32> to vector<16x32xf32>
    %291 = arith.addf %287, %290 : vector<16x32xf32>
    %292 = arith.addf %291, %262 : vector<16x32xf32>
    %c1_126 = arith.constant 1 : index
    %c0_127 = arith.constant 0 : index
    %c0_128 = arith.constant 0 : index
    %293 = vector.load %arg17[%c1_126, %c0_127, %c0_128] : memref<2x1x32xf32, #tpu.memory_space<vmem>>, vector<1x1x32xf32>
    %294 = vector.shape_cast %293 : vector<1x1x32xf32> to vector<1x32xf32>
    %c1_129 = arith.constant 1 : index
    %c0_130 = arith.constant 0 : index
    %c0_131 = arith.constant 0 : index
    %295 = vector.load %arg18[%c1_129, %c0_130, %c0_131] : memref<2x1x32xf32, #tpu.memory_space<vmem>>, vector<1x1x32xf32>
    %296 = vector.shape_cast %295 : vector<1x1x32xf32> to vector<1x32xf32>
    %cst_132 = arith.constant dense<0.000000e+00> : vector<16xf32>
    %297 = vector.multi_reduction <add>, %292, %cst_132 [1] : vector<16x32xf32> to vector<16xf32>
    %298 = vector.shape_cast %297 : vector<16xf32> to vector<16x1xf32>
    %cst_133 = arith.constant 3.200000e+01 : f32
    %299 = vector.broadcast %cst_133 : f32 to vector<16x1xf32>
    %300 = arith.divf %298, %299 : vector<16x1xf32>
    %301 = arith.mulf %292, %292 : vector<16x32xf32>
    %cst_134 = arith.constant dense<0.000000e+00> : vector<16xf32>
    %302 = vector.multi_reduction <add>, %301, %cst_134 [1] : vector<16x32xf32> to vector<16xf32>
    %303 = vector.shape_cast %302 : vector<16xf32> to vector<16x1xf32>
    %cst_135 = arith.constant 3.200000e+01 : f32
    %304 = vector.broadcast %cst_135 : f32 to vector<16x1xf32>
    %305 = arith.divf %303, %304 : vector<16x1xf32>
    %306 = arith.mulf %300, %300 : vector<16x1xf32>
    %307 = arith.subf %305, %306 : vector<16x1xf32>
    %cst_136 = arith.constant 0.000000e+00 : f32
    %308 = vector.broadcast %cst_136 : f32 to vector<16x1xf32>
    %309 = arith.maximumf %307, %308 : vector<16x1xf32>
    %310 = vector.broadcast %300 : vector<16x1xf32> to vector<16x32xf32>
    %311 = arith.subf %292, %310 : vector<16x32xf32>
    %cst_137 = arith.constant 9.99999996E-13 : f32
    %312 = vector.broadcast %cst_137 : f32 to vector<16x1xf32>
    %313 = arith.addf %309, %312 : vector<16x1xf32>
    %314 = math.rsqrt %313 : vector<16x1xf32>
    %315 = vector.broadcast %314 : vector<16x1xf32> to vector<16x32xf32>
    %316 = arith.mulf %311, %315 : vector<16x32xf32>
    %317 = vector.broadcast %294 : vector<1x32xf32> to vector<16x32xf32>
    %318 = arith.mulf %316, %317 : vector<16x32xf32>
    %319 = vector.broadcast %296 : vector<1x32xf32> to vector<16x32xf32>
    %320 = arith.addf %318, %319 : vector<16x32xf32>
    %321 = arith.truncf %320 : vector<16x32xf32> to vector<16x32xbf16>
    %c0_138 = arith.constant 0 : index
    %c0_139 = arith.constant 0 : index
    %322 = vector.load %arg19[%c0_138, %c0_139] : memref<32x128xbf16, #tpu.memory_space<vmem>>, vector<32x128xbf16>
    %cst_140 = arith.constant dense<0.000000e+00> : vector<16x128xf32>
    %323 = tpu.matmul %321, %322, %cst_140 {dimension_numbers = #tpu.dot_dimension_numbers<[1], [0], [0], [1], [0, 0, 1, 1], [], []>} : vector<16x32xbf16>, vector<32x128xbf16>, vector<16x128xf32> -> vector<16x128xf32>
    %c0_141 = arith.constant 0 : index
    %c0_142 = arith.constant 0 : index
    %324 = vector.load %arg20[%c0_141, %c0_142] : memref<1x128xf32, #tpu.memory_space<vmem>>, vector<1x128xf32>
    %325 = vector.broadcast %324 : vector<1x128xf32> to vector<16x128xf32>
    %326 = arith.addf %323, %325 : vector<16x128xf32>
    %c0_143 = arith.constant 0 : index
    %c0_144 = arith.constant 0 : index
    %327 = vector.load %arg21[%c0_143, %c0_144] : memref<16x128xf32, #tpu.memory_space<vmem>>, vector<16x128xf32>
    tpu.vector_store %arg21[%c0_143, %c0_144], %326 {strides = array<i32>} : memref<16x128xf32, #tpu.memory_space<vmem>>, vector<16x128xf32>,
    %cst_145 = arith.constant 0.000000e+00 : f32
    %328 = vector.broadcast %cst_145 : f32 to vector<16x96xf32>
    %329 = tpu.concatenate %320, %328 in 1 : vector<16x32xf32>, vector<16x96xf32> -> vector<16x128xf32>
    %c0_146 = arith.constant 0 : index
    %c0_147 = arith.constant 0 : index
    %330 = vector.load %arg22[%c0_146, %c0_147] : memref<16x128xf32, #tpu.memory_space<vmem>>, vector<16x128xf32>
    tpu.vector_store %arg22[%c0_146, %c0_147], %329 {strides = array<i32>} : memref<16x128xf32, #tpu.memory_space<vmem>>, vector<16x128xf32>,
    return
  }
  func.func @transform_0(%arg0: i32) -> (i32, i32) {
    %c0_i32 = arith.constant 0 : i32
    %c0_i32_0 = arith.constant 0 : i32
    %c0_i32_1 = arith.constant 0 : i32
    return %c0_i32, %c0_i32_0 : i32, i32
  }
  func.func @transform_1(%arg0: i32) -> (i32, i32) {
    %c0_i32 = arith.constant 0 : i32
    %c0_i32_0 = arith.constant 0 : i32
    %c0_i32_1 = arith.constant 0 : i32
    return %c0_i32, %c0_i32_0 : i32, i32
  }
  func.func @transform_2(%arg0: i32) -> (i32, i32) {
    %c0_i32 = arith.constant 0 : i32
    %c0_i32_0 = arith.constant 0 : i32
    %c0_i32_1 = arith.constant 0 : i32
    return %c0_i32, %c0_i32_0 : i32, i32
  }
  func.func @transform_3(%arg0: i32) -> (i32, i32) {
    %c0_i32 = arith.constant 0 : i32
    %c0_i32_0 = arith.constant 0 : i32
    %c0_i32_1 = arith.constant 0 : i32
    return %c0_i32, %c0_i32_0 : i32, i32
  }
  func.func @transform_4(%arg0: i32) -> (i32, i32) {
    %c0_i32 = arith.constant 0 : i32
    %c0_i32_0 = arith.constant 0 : i32
    %c0_i32_1 = arith.constant 0 : i32
    return %c0_i32, %c0_i32_0 : i32, i32
  }
  func.func @transform_5(%arg0: i32) -> (i32, i32) {
    %c0_i32 = arith.constant 0 : i32
    %c0_i32_0 = arith.constant 0 : i32
    %c0_i32_1 = arith.constant 0 : i32
    return %c0_i32, %c0_i32_0 : i32, i32
  }
  func.func @transform_6(%arg0: i32) -> (i32, i32, i32) {
    %c0_i32 = arith.constant 0 : i32
    %c0_i32_0 = arith.constant 0 : i32
    %c0_i32_1 = arith.constant 0 : i32
    %c0_i32_2 = arith.constant 0 : i32
    return %c0_i32, %c0_i32_0, %c0_i32_1 : i32, i32, i32
  }
  func.func @transform_7(%arg0: i32) -> (i32, i32, i32) {
    %c0_i32 = arith.constant 0 : i32
    %c0_i32_0 = arith.constant 0 : i32
    %c0_i32_1 = arith.constant 0 : i32
    %c0_i32_2 = arith.constant 0 : i32
    return %c0_i32, %c0_i32_0, %c0_i32_1 : i32, i32, i32
  }
  func.func @transform_8(%arg0: i32) -> (i32, i32, i32) {
    %c0_i32 = arith.constant 0 : i32
    %c0_i32_0 = arith.constant 0 : i32
    %c0_i32_1 = arith.constant 0 : i32
    %c0_i32_2 = arith.constant 0 : i32
    return %c0_i32, %c0_i32_0, %c0_i32_1 : i32, i32, i32
  }
  func.func @transform_9(%arg0: i32) -> (i32, i32, i32) {
    %c0_i32 = arith.constant 0 : i32
    %c0_i32_0 = arith.constant 0 : i32
    %c0_i32_1 = arith.constant 0 : i32
    %c0_i32_2 = arith.constant 0 : i32
    return %c0_i32, %c0_i32_0, %c0_i32_1 : i32, i32, i32
  }
  func.func @transform_10(%arg0: i32) -> (i32, i32, i32) {
    %c0_i32 = arith.constant 0 : i32
    %c0_i32_0 = arith.constant 0 : i32
    %c0_i32_1 = arith.constant 0 : i32
    %c0_i32_2 = arith.constant 0 : i32
    return %c0_i32, %c0_i32_0, %c0_i32_1 : i32, i32, i32
  }
  func.func @transform_11(%arg0: i32) -> (i32, i32, i32) {
    %c0_i32 = arith.constant 0 : i32
    %c0_i32_0 = arith.constant 0 : i32
    %c0_i32_1 = arith.constant 0 : i32
    %c0_i32_2 = arith.constant 0 : i32
    return %c0_i32, %c0_i32_0, %c0_i32_1 : i32, i32, i32
  }
  func.func @transform_12(%arg0: i32) -> (i32, i32, i32) {
    %c0_i32 = arith.constant 0 : i32
    %c0_i32_0 = arith.constant 0 : i32
    %c0_i32_1 = arith.constant 0 : i32
    %c0_i32_2 = arith.constant 0 : i32
    return %c0_i32, %c0_i32_0, %c0_i32_1 : i32, i32, i32
  }
  func.func @transform_13(%arg0: i32) -> (i32, i32, i32) {
    %c0_i32 = arith.constant 0 : i32
    %c0_i32_0 = arith.constant 0 : i32
    %c0_i32_1 = arith.constant 0 : i32
    %c0_i32_2 = arith.constant 0 : i32
    return %c0_i32, %c0_i32_0, %c0_i32_1 : i32, i32, i32
  }
  func.func @transform_14(%arg0: i32) -> (i32, i32, i32) {
    %c0_i32 = arith.constant 0 : i32
    %c0_i32_0 = arith.constant 0 : i32
    %c0_i32_1 = arith.constant 0 : i32
    %c0_i32_2 = arith.constant 0 : i32
    return %c0_i32, %c0_i32_0, %c0_i32_1 : i32, i32, i32
  }
  func.func @transform_15(%arg0: i32) -> (i32, i32, i32) {
    %c0_i32 = arith.constant 0 : i32
    %c0_i32_0 = arith.constant 0 : i32
    %c0_i32_1 = arith.constant 0 : i32
    %c0_i32_2 = arith.constant 0 : i32
    return %c0_i32, %c0_i32_0, %c0_i32_1 : i32, i32, i32
  }
  func.func @transform_16(%arg0: i32) -> (i32, i32, i32) {
    %c0_i32 = arith.constant 0 : i32
    %c0_i32_0 = arith.constant 0 : i32
    %c0_i32_1 = arith.constant 0 : i32
    %c0_i32_2 = arith.constant 0 : i32
    return %c0_i32, %c0_i32_0, %c0_i32_1 : i32, i32, i32
  }
  func.func @transform_17(%arg0: i32) -> (i32, i32, i32) {
    %c0_i32 = arith.constant 0 : i32
    %c0_i32_0 = arith.constant 0 : i32
    %c0_i32_1 = arith.constant 0 : i32
    %c0_i32_2 = arith.constant 0 : i32
    return %c0_i32, %c0_i32_0, %c0_i32_1 : i32, i32, i32
  }
  func.func @transform_18(%arg0: i32) -> (i32, i32) {
    %c0_i32 = arith.constant 0 : i32
    %c0_i32_0 = arith.constant 0 : i32
    %c0_i32_1 = arith.constant 0 : i32
    return %c0_i32, %c0_i32_0 : i32, i32
  }
  func.func @transform_19(%arg0: i32) -> (i32, i32) {
    %c0_i32 = arith.constant 0 : i32
    %c0_i32_0 = arith.constant 0 : i32
    %c0_i32_1 = arith.constant 0 : i32
    return %c0_i32, %c0_i32_0 : i32, i32
  }
  func.func @transform_20(%arg0: i32) -> (i32, i32) {
    %c0_i32 = arith.constant 0 : i32
    %c0_i32_0 = arith.constant 0 : i32
    %c0_i32_1 = arith.constant 0 : i32
    return %c0_i32, %c0_i32_0 : i32, i32
  }
  func.func @transform_21(%arg0: i32) -> (i32, i32) {
    %c0_i32 = arith.constant 0 : i32
    %c0_i32_0 = arith.constant 0 : i32
    %c0_i32_1 = arith.constant 0 : i32
    return %c0_i32, %c0_i32_0 : i32, i32
  }
}

</mosaic_0001>

<bundles_post_ra>
// kernel: hftc_forward.1
= control target key start
LH: loop header
LB: loop body
LE: loop exit
PB: predicated region body
PF: predicated region fallthrough
CT: control target
= control target key end

     0   :  { %v2643_v0 = vmov 0   ;;  %v70_v27 = vlaneseq  ;;  %v2644_v30 = vmov 1.0   ;;  %vm180_vm2 = vcmask 261120   ;;  %s2647_s22 = smov 112   ;;  %s3213_s0 = inlined_call_operand.vmem [shape: s32[16,1], index: 0, kind: input, shape index: {}]   ;;  %s3214_s2 = inlined_call_operand.vmem [shape: f32[128,32], index: 2, kind: input, shape index: {}]   ;;  %s3215_s3 = inlined_call_operand.vmem [shape: f32[8,32], index: 3, kind: input, shape index: {}]   ;;  %s3216_s6 = inlined_call_operand.vmem [shape: bf16[2,32,96], index: 6, kind: input, shape index: {}]   ;;  %s3217_s4 = inlined_call_operand.vmem [shape: f32[1,32], index: 4, kind: input, shape index: {}]   ;;  %s3218_s5 = inlined_call_operand.vmem [shape: f32[1,32], index: 5, kind: input, shape index: {}]   ;;  %s3219_s7 = inlined_call_operand.vmem [shape: f32[2,1,96], index: 7, kind: input, shape index: {}]   ;;  %s3220_s1 = inlined_call_operand.vmem [shape: f32[2,8], index: 1, kind: input, shape index: {}]   ;;  %s3221_s8 = inlined_call_operand.vmem [shape: bf16[2,32,32], index: 8, kind: input, shape index: {}]   ;;  %s3222_s9 = inlined_call_operand.vmem [shape: f32[2,1,32], index: 9, kind: input, shape index: {}]   ;;  %s3223_s12 = inlined_call_operand.vmem [shape: bf16[2,32,64], index: 12, kind: input, shape index: {}]   ;;  %s3224_s10 = inlined_call_operand.vmem [shape: f32[2,1,32], index: 10, kind: input, shape index: {}]   ;;  %s3225_s11 = inlined_call_operand.vmem [shape: f32[2,1,32], index: 11, kind: input, shape index: {}]   ;;  %s3226_s14 = inlined_call_operand.vmem [shape: bf16[2,64,32], index: 14, kind: input, shape index: {}]   ;;  %s3227_s13 = inlined_call_operand.vmem [shape: f32[2,1,64], index: 13, kind: input, shape index: {}]   ;;  %s3228_s15 = inlined_call_operand.vmem [shape: f32[2,1,32], index: 15, kind: input, shape index: {}]   ;;  %s3229_s16 = inlined_call_operand.vmem [shape: f32[2,1,32], index: 16, kind: input, shape index: {}]   ;;  %s3230_s17 = inlined_call_operand.vmem [shape: f32[2,1,32], index: 17, kind: input, shape index: {}]   ;;  %s3231_s18 = inlined_call_operand.vmem [shape: bf16[32,128], index: 18, kind: input, shape index: {}]   ;;  %s3232_s21 = inlined_call_operand.vmem [shape: f32[16,128], index: 21, kind: output, shape index: {1}]   ;;  %s3233_s19 = inlined_call_operand.vmem [shape: f32[1,128], index: 19, kind: input, shape index: {}]   ;;  %s3234_s20 = inlined_call_operand.vmem [shape: f32[16,128], index: 20, kind: output, shape index: {0}]  }
   0x1   :  { %3238 = sst [smem:[#allocation2_spill]] %s3213_s0  ;;  %2550 = vset.pattern.permute.xlu0 %v2643_v0  ;;  %v2645_v44 = vmov 0.0   ;;  %vm2646_vm3 = vmmov 0   ;;  %vm336_vm4 = vcmask 130048   ;;  %vm545_vm5 = vcmask 64512  }
   0x2   :  { %3239 = sst [smem:[#allocation3_spill]] %s3214_s2  ;;  %s3244_s26 = sld [smem:[#allocation2_spill]]  ;;  %v71_v28 = vand.u32 127, %v70_v27  ;;  %2333 = vmatprep.subr.bf16.mxu1 %v2645_v44  ;;  %2337 = vmatprep.mubr.msk.bf16.mxu1 %vm2646_vm3, %v2645_v44  ;;  %vm599_vm6 = vcmask 1043456   ;;  %vm1043_vm7 = vcmask 523264  }
   0x3   :  { %3240 = sst [smem:[#allocation4_spill]] %s3215_s3  ;;  %s3245_s28 = sld [smem:[#allocation3_spill]] }
   0x4   :  { %3241 = sst [smem:[#allocation5_spill]] %s3216_s6  ;;  %s3246_s23 = sld [smem:[#allocation4_spill]] }
   0x5   :  { %3242 = sst [smem:[#allocation6_spill]] %s3217_s4  ;;  %s3247_s24 = sld [smem:[#allocation5_spill]] }
   0x6   :  { %3243 = sst [smem:[#allocation7_spill]] %s3218_s5  ;;  %s3248_s29 = sld [smem:[#allocation6_spill]] }
   0x7   :  { %s3249_s4 = sld [smem:[#allocation7_spill]] }
   0x8   :  { %v68_v1 = vld [vmem:[%s3244_s26] sm:$0xff]  ;;  %v69_v6 = vld [vmem:[%s3244_s26 + $0x8] sm:$0xff] }
   0x9   :  { %v84_v2 = vld [vmem:[%s3245_s28] sm:$0xff]  ;;  %73 = vperm.xlu0 %2550, %v68_v1   ;;  %v85_v3 = vld [vmem:[%s3245_s28 + $0x8] sm:$0xff]  ;;  %v86_v4 = vld [vmem:[%s3245_s28 + $0x10] sm:$0xff] }
   0xa   :  { %v87_v5 = vld [vmem:[%s3245_s28 + $0x18] sm:$0xff]  ;;  %v2509_v7 = vpack.c.bf16 %v85_v3, %v84_v2  ;;  %v88_v9 = vld [vmem:[%s3245_s28 + $0x20] sm:$0xff]  ;;  %v89_v10 = vld [vmem:[%s3245_s28 + $0x28] sm:$0xff] }
   0xb   :  { %v2513_v8 = vpack.c.bf16 %v87_v5, %v86_v4  ;;  %v2517_v11 = vpack.c.bf16 %v89_v10, %v88_v9  ;;  %v90_v12 = vld [vmem:[%s3245_s28 + $0x30] sm:$0xff]  ;;  %v91_v13 = vld [vmem:[%s3245_s28 + $0x38] sm:$0xff]  ;;  %v92_v15 = vld [vmem:[%s3245_s28 + $0x40] sm:$0xff] }
   0xc   :  { %2510 = vmatprep.subr.bf16.mxu0 %v2509_v7  ;;  %v2521_v14 = vpack.c.bf16 %v91_v13, %v90_v12  ;;  %v93_v16 = vld [vmem:[%s3245_s28 + $0x48] sm:$0xff]  ;;  %v94_v18 = vld [vmem:[%s3245_s28 + $0x50] sm:$0xff]  ;;  %v95_v19 = vld [vmem:[%s3245_s28 + $0x58] sm:$0xff] }
   0xd   :  { %76 = vperm.xlu0 %2550, %v69_v6   ;;  %2512 = vmatpush3.bf16.msra.mxu0 %v2509_v7  ;;  %v2525_v17 = vpack.c.bf16 %v93_v16, %v92_v15  ;;  %v2529_v20 = vpack.c.bf16 %v95_v19, %v94_v18  ;;  %v96_v21 = vld [vmem:[%s3245_s28 + $0x60] sm:$0xff]  ;;  %v97_v22 = vld [vmem:[%s3245_s28 + $0x68] sm:$0xff]  ;;  %v98_v24 = vld [vmem:[%s3245_s28 + $0x70] sm:$0xff] }
   0xe   :  { %2514 = vmatprep.subr.bf16.mxu0 %v2513_v8  ;;  %v2533_v23 = vpack.c.bf16 %v97_v22, %v96_v21  ;;  %v99_v25 = vld [vmem:[%s3245_s28 + $0x78] sm:$0xff]  ;;  %v175_v32 = vld [vmem:[%s3246_s23] sm:$0xff]  ;;  %v2562_v45 = vld [vmem:[%s3247_s24 + $0x8] sm:$0xff]   ;;  %s2648_s23 = smov 96  }
   0xf   :  { %v2537_v26 = vpack.c.bf16 %v99_v25, %v98_v24  ;;  %v2561_v43 = vld [vmem:[%s3247_s24] sm:$0xff]  }
  0x10   :  { %2334 = vmatpush3.bf16.msra.mxu1 %v2561_v43  ;;  %v2110_v0 = vld [vmem:[%s3248_s29] ss:$0 sm:$0xff]  ;;  %s2651_s29 = smov 16  }
  0x11   :  { %2516 = vmatpush3.bf16.msra.mxu0 %v2513_v8  ;;  %2335 = vmatprep.subr.bf16.mxu1 %v2645_v44  ;;  %v2111_v6 = vld [vmem:[%s3249_s4] ss:$0 sm:$0xff] }
  0x12   :  { %2518 = vmatprep.subr.bf16.mxu0 %v2517_v11 }
  0x14   :  { %2336 = vmatpush3.bf16.msra.mxu1 %v2562_v45 }
  0x15   :  { %2520 = vmatpush3.bf16.msra.mxu0 %v2517_v11  ;;  %2341 = vmatprep.subr.bf16.mxu1 %v2645_v44  ;;  %v2113_v11 = vld [vmem:[%s3219_s7] ss:$0 sm:$0xff] }
  0x16   :  { %2522 = vmatprep.subr.bf16.mxu0 %v2521_v14 }
  0x19   :  { %2524 = vmatpush3.bf16.msra.mxu0 %v2521_v14 }
  0x1a   :  { %2526 = vmatprep.subr.bf16.mxu0 %v2525_v17 }
  0x1d   :  { %2528 = vmatpush3.bf16.msra.mxu0 %v2525_v17 }
  0x1e   :  { %2530 = vmatprep.subr.bf16.mxu0 %v2529_v20 }
  0x21   :  { %2532 = vmatpush3.bf16.msra.mxu0 %v2529_v20 }
  0x22   :  { %2534 = vmatprep.subr.bf16.mxu0 %v2533_v23 }
  0x25   :  { %2536 = vmatpush3.bf16.msra.mxu0 %v2533_v23 }
  0x26   :  { %2538 = vmatprep.subr.bf16.mxu0 %v2537_v26 }
  0x29   :  { %2540 = vmatpush3.bf16.msra.mxu0 %v2537_v26 }
  0x2a   :  { %2359 = vmatprep.subr.bf16.mxu0 %v2645_v44 }
  0x88   :  { %v74_v29 = vpop.permute.xlu0 %73 }
  0x89   :  { %vm78_vm0 = vcmp.eq.s32.totalorder %v74_v29, %v71_v28 }
  0x8a   :  { %2330 = vmatprep.mubr.msk.f32.mxu0 %vm78_vm0, %v2644_v30 }
  0x8c   :  { %v77_v31 = vpop.permute.xlu0 %76 }
  0x8d   :  { %vm79_vm1 = vcmp.eq.s32.totalorder %v77_v31, %v71_v28 }
  0x8e   :  { %2331 = vmatmul.mubr.msk.f32.vlgmr.msra.gmra.mrb[0].mxu0 %vm79_vm1, %v2644_v30 }
  0x8f   :  { %2361 = vmatprep.mubr.msk.bf16.mxu0 %vm2646_vm3, %v2645_v44 }
 0x161   :  { %v2332_v33 = vpop.f32.mrb[0].mxu0 }
 0x162   :  { %v177_v34 = vadd.f32 %v2332_v33, %v175_v32  ;;  %v166_v35 = vpop.f32.mrb[1].mxu0  ;;  %v2649_v33 = vmov 1966171168  }
 0x163   :  { %v176_v36 = vadd.f32 %v175_v32, %v166_v35 }
 0x164   :  { %v184_v37 = vsel %vm180_vm2, %v177_v34, 0.0  ;;  %v191_v41 = vmul.f32 %v177_v34, %v177_v34 }
 0x165   :  { %185 = vadd.xlane.f32.xlu1 %v184_v37  ;;  %v190_v38 = vmul.f32 %v176_v36, %v176_v36  ;;  %v181_v40 = vsel %vm180_vm2, %v176_v36, 0.0 }
 0x166   :  { %v195_v42 = vsel %vm180_vm2, %v191_v41, 0.0 }
 0x167   :  { %v192_v39 = vsel %vm180_vm2, %v190_v38, 0.0  ;;  %v2112_v38 = vld.sshfl [vmem:[%s3220_s1] sm:$0x11 pattern:$0x75316420]  ;;  %s2650_s1 = smov 64  }
 0x168   :  { %193 = vadd.xlane.f32.xlu0 %v192_v39  ;;  %v239_v41 = vcombine.high %v2112_v38, %v2112_v38 }
 0x169   :  { %182 = vadd.xlane.f32.xlu1 %v181_v40 }
 0x16d   :  { %196 = vadd.xlane.f32.xlu1 %v195_v42 }
 0x1f2   :  { %v186_v46 = vpop.xlane.xlu1 %185 }
 0x1f3   :  { %v189_v49 = vmul.f32 0.03125, %v186_v46 }
 0x1f5   :  { %v194_v47 = vpop.xlane.xlu0 %193  ;;  %v201_v54 = vmul.f32 %v189_v49, %v189_v49  ;;  %v207_v1 = vsub.f32 %v177_v34, %v189_v49  ;;  %v241_v34 = vunpack.c.l.s4 %v2649_v33 }
 0x1f6   :  { %v183_v48 = vpop.xlane.xlu1 %182  ;;  %v198_v51 = vmul.f32 0.03125, %v194_v47 }
 0x1f7   :  { %v188_v50 = vmul.f32 0.03125, %v183_v48  ;;  %v242_v35 = vunpack.c.0.s8 %v241_v34 }
 0x1f9   :  { %v200_v52 = vmul.f32 %v188_v50, %v188_v50  ;;  %v206_v62 = vsub.f32 %v176_v36, %v188_v50  ;;  %v244_v36 = vshrl.u32 %v70_v27, 7 }
 0x1fa   :  { %v197_v53 = vpop.xlane.xlu1 %196 }
 0x1fb   :  { %v202_v55 = vsub.f32 %v198_v51, %v200_v52  ;;  %v199_v56 = vmul.f32 0.03125, %v197_v53  ;;  %v245_v37 = vsub.s32 %v242_v35, %v244_v36  ;;  %v533_v40 = vsub.s32 0, %v244_v36 }
 0x1fd   :  { %v204_v57 = vmax.f32 %v202_v55, 0.0  ;;  %v203_v58 = vsub.f32 %v199_v56, %v201_v54  ;;  %v246_v39 = vrot.slane %v2112_v38, %v245_v37  ;;  %v253_v48 = vrot.slane %v239_v41, %v245_v37 }
 0x1ff   :  { %v208_v59 = vadd.f32 1e-12, %v204_v57  ;;  %v205_v60 = vmax.f32 %v203_v58, 0.0  ;;  %v2901_v42 = vrot.slane %v246_v39, %v533_v40  ;;  %v2905_v51 = vrot.slane %v253_v48, %v533_v40 }
 0x201   :  { %2583 = vrsqrt.f32 %v208_v59  ;;  %v209_v61 = vadd.f32 1e-12, %v205_v60 }
 0x203   :  { %2585 = vrsqrt.f32 %v209_v61 }
 0x20b   :  { %v2584_v63 = vpop.eup %2583 }
 0x20c   :  { %v212_v2 = vmul.f32 %v2584_v63, %v206_v62 }
 0x20d   :  { %v2586_v3 = vpop.eup %2585 }
 0x20e   :  { %v220_v4 = vmul.f32 %v2110_v0, %v212_v2  ;;  %v213_v5 = vmul.f32 %v2586_v3, %v207_v1 }
 0x210   :  { %v221_v7 = vmul.f32 %v2110_v0, %v213_v5  ;;  %v2844_v8 = vadd.f32 %v2111_v6, %v220_v4 }
 0x212   :  { %v2846_v9 = vadd.f32 %v2111_v6, %v221_v7 }
 0x214   :  { %v254_v10 = vpack.c.bf16 %v2846_v9, %v2844_v8 }
 0x216   :  { %2338 = vmatmul.mubr.msk.bf16.vlgmr.msra.gmra.mrb[0].mxu1 %vm180_vm2, %v254_v10 }
 0x217   :  { %2343 = vmatprep.mubr.msk.bf16.mxu1 %vm2646_vm3, %v2645_v44 }
 0x2e9   :  { %v315_v12 = vpop.f32.mrb[0].mxu1 }
 0x2ea   :  { %v2339_v13 = vpop.f32.mrb[1].mxu1  ;;  %v316_v15 = vadd.f32 %v2113_v11, %v315_v12 }
 0x2eb   :  { %v318_v14 = vpop.f32.mrb[2].mxu1 }
 0x2ec   :  { %v319_v16 = vadd.f32 %v2113_v11, %v318_v14  ;;  %v2340_v17 = vpop.f32.mrb[3].mxu1  ;;  %v2857_v19 = vpack.c.bf16 %v316_v15, %v316_v15 }
 0x2ee   :  { %v322_v18 = vpack.c.bf16 %v319_v16, %v316_v15  ;;  %v2861_v20 = vpack.c.bf16 %v319_v16, %v319_v16 }
 0x2f0   :  { %324 = vrot.lane.b32.xlu1 %v322_v18, %s2647_s22 }
 0x2f4   :  { %334 = vrot.lane.b32.xlu1 %v2857_v19, %s2648_s23 }
 0x2f8   :  { %383 = vrot.lane.b32.xlu1 %v2861_v20, %s2648_s23 }
 0x362   :  { %v325_v21 = vpop.permute.xlu1 %324 }
 0x363   :  { %v2865_v22 = vcombine.low %v325_v21, %v325_v21  ;;  %v2867_v23 = vcombine.high %v325_v21, %v325_v21 }
 0x365   :  { %479 = vrot.lane.b32.xlu0 %v2867_v23, %s2648_s23  ;;  %431 = vrot.lane.b32.xlu1 %v2865_v22, %s2648_s23 }
 0x366   :  { %v335_v24 = vpop.permute.xlu1 %334 }
 0x367   :  { %v341_v25 = vsel %vm336_vm4, %v335_v24, 0 }
 0x368   :  { %2342 = vmatpush3.bf16.xpose.msra.mxu1 %v341_v25 }
 0x369   :  { %2347 = vmatprep.subr.bf16.mxu1 %v2645_v44 }
 0x36a   :  { %v384_v26 = vpop.permute.xlu1 %383 }
 0x36b   :  { %v389_v28 = vsel %vm336_vm4, %v384_v26, 0 }
 0x36f   :  { %2344 = vmatmul.mubr.msk.bf16.vlgmr.msra.gmra.mrb[4].mxu1 %vm336_vm4, %v2857_v19 }
 0x370   :  { %2348 = vmatpush3.bf16.xpose.msra.mxu1 %v389_v28  ;;  %2349 = vmatprep.mubr.msk.bf16.mxu1 %vm2646_vm3, %v2645_v44 }
 0x371   :  { %2353 = vmatprep.subr.bf16.mxu1 %v2645_v44 }
 0x377   :  { %2350 = vmatmul.mubr.msk.bf16.vlgmr.msra.gmra.mrb[8].mxu1 %vm336_vm4, %v2861_v20 }
 0x378   :  { %2355 = vmatprep.mubr.msk.bf16.mxu1 %vm2646_vm3, %v2645_v44 }
 0x3d7   :  { %v480_v29 = vpop.permute.xlu0 %479  ;;  %v432_v30 = vpop.permute.xlu1 %431 }
 0x3d8   :  { %v485_v31 = vsel %vm336_vm4, %v480_v29, 0  ;;  %v437_v32 = vsel %vm336_vm4, %v432_v30, 0 }
 0x3d9   :  { %2354 = vmatpush3.bf16.xpose.msra.mxu1 %v437_v32  ;;  %2360 = vmatpush3.bf16.xpose.msra.mxu0 %v485_v31 }
 0x3da   :  { %2365 = vmatprep.subr.bf16.mxu1 %v2645_v44  ;;  %2371 = vmatprep.subr.bf16.mxu0 %v2645_v44 }
 0x3e0   :  { %2356 = vmatmul.mubr.msk.bf16.vlgmr.msra.gmra.mrb[12].mxu1 %vm336_vm4, %v2865_v22  ;;  %2362 = vmatmul.mubr.msk.bf16.vlgmr.msra.gmra.mrb[4].mxu0 %vm336_vm4, %v2867_v23 }
 0x3e1   :  { %2367 = vmatprep.mubr.msk.bf16.mxu1 %vm2646_vm3, %v2645_v44  ;;  %2373 = vmatprep.mubr.msk.bf16.mxu0 %vm2646_vm3, %v2645_v44 }
 0x442   :  { %v377_v43 = vpop.f32.mrb[4].mxu1 }
 0x443   :  { %v527_v45 = vmul.f32 0.25, %v377_v43  ;;  %v2345_v46 = vpop.f32.mrb[5].mxu1 }
 0x444   :  { %v380_v47 = vpop.f32.mrb[6].mxu1 }
 0x445   :  { %v2346_v49 = vpop.f32.mrb[7].mxu1  ;;  %v541_v50 = vadd.f32 %v2901_v42, %v527_v45 }
 0x447   :  { %v546_v27 = vsel %vm545_vm5, %v541_v50, -inf }
 0x448   :  { %547 = vmax.xlane.f32.xlu1 %v546_v27 }
 0x44a   :  { %v425_v52 = vpop.f32.mrb[8].mxu1 }
 0x44b   :  { %v528_v53 = vmul.f32 0.25, %v425_v52  ;;  %v2351_v54 = vpop.f32.mrb[9].mxu1 }
 0x44c   :  { %v428_v55 = vpop.f32.mrb[10].mxu1 }
 0x44d   :  { %v2352_v56 = vpop.f32.mrb[11].mxu1  ;;  %v542_v57 = vadd.f32 %v2905_v51, %v528_v53 }
 0x44f   :  { %v549_v58 = vsel %vm545_vm5, %v542_v57, -inf }
 0x450   :  { %550 = vmax.xlane.f32.xlu0 %v549_v58  ;;  %v2563_v58 = vld [vmem:[%s3221_s8] sm:$0xff]  }
 0x466   :  { %594 = vrot.lane.b32.xlu0 %v2857_v19, %s2650_s1 }
 0x4b3   :  { %v473_v59 = vpop.f32.mrb[12].mxu1  ;;  %v521_v60 = vpop.f32.mrb[4].mxu0 }
 0x4b4   :  { %v529_v61 = vmul.f32 0.25, %v473_v59  ;;  %v530_v62 = vmul.f32 0.25, %v521_v60  ;;  %v2357_v63 = vpop.f32.mrb[13].mxu1  ;;  %v2363_v0 = vpop.f32.mrb[5].mxu0 }
 0x4b5   :  { %v476_v1 = vpop.f32.mrb[14].mxu1  ;;  %v524_v2 = vpop.f32.mrb[6].mxu0 }
 0x4b6   :  { %v2358_v3 = vpop.f32.mrb[15].mxu1  ;;  %v2364_v4 = vpop.f32.mrb[7].mxu0  ;;  %v543_v5 = vadd.f32 %v2901_v42, %v529_v61  ;;  %v544_v7 = vadd.f32 %v2905_v51, %v530_v62 }
 0x4b7   :  { %v2564_v3 = vld [vmem:[%s3221_s8 + $0x8] sm:$0xff]  }
 0x4b8   :  { %v552_v6 = vsel %vm545_vm5, %v543_v5, -inf  ;;  %v555_v10 = vsel %vm545_vm5, %v544_v7, -inf }
 0x4b9   :  { %553 = vmax.xlane.f32.xlu1 %v552_v6 }
 0x4bd   :  { %556 = vmax.xlane.f32.xlu1 %v555_v10 }
 0x4ce   :  { %643 = vrot.lane.b32.xlu1 %v2861_v20, %s2650_s1 }
 0x4d5   :  { %v548_v11 = vpop.xlane.xlu1 %547 }
 0x4d6   :  { %v558_v12 = vsub.f32 %v541_v50, %v548_v11 }
 0x4d8   :  { %v562_v14 = vmul.f32 1.442695, %v558_v12 }
 0x4da   :  { %2587 = vpow2.f32 %v562_v14 }
 0x4dd   :  { %v551_v13 = vpop.xlane.xlu0 %550 }
 0x4de   :  { %v559_v15 = vsub.f32 %v542_v57, %v551_v13 }
 0x4e0   :  { %v564_v18 = vmul.f32 1.442695, %v559_v15 }
 0x4e1   :  { %v595_v16 = vpop.permute.xlu0 %594 }
 0x4e2   :  { %v601_v17 = vsel %vm599_vm6, %v595_v16, 0  ;;  %2589 = vpow2.f32 %v564_v18 }
 0x4e3   :  { %2366 = vmatpush3.bf16.msra.mxu1 %v601_v17 }
 0x4e4   :  { %2377 = vmatprep.subr.bf16.mxu1 %v2645_v44  ;;  %v2588_v19 = vpop.eup %2587 }
 0x4e5   :  { %v570_v21 = vsel %vm545_vm5, %v2588_v19, 0.0 }
 0x4ec   :  { %v2590_v24 = vpop.eup %2589 }
 0x4ed   :  { %v573_v20 = vsel %vm545_vm5, %v2590_v24, 0.0 }
 0x4f2   :  { %571 = vadd.xlane.f32.xlu1 %v570_v21 }
 0x4f6   :  { %574 = vadd.xlane.f32.xlu1 %v573_v20 }
 0x546   :  { %v554_v25 = vpop.xlane.xlu1 %553 }
 0x547   :  { %v560_v26 = vsub.f32 %v543_v5, %v554_v25 }
 0x549   :  { %v566_v28 = vmul.f32 1.442695, %v560_v26 }
 0x54a   :  { %v557_v29 = vpop.xlane.xlu1 %556 }
 0x54b   :  { %2591 = vpow2.f32 %v566_v28  ;;  %v561_v30 = vsub.f32 %v544_v7, %v557_v29 }
 0x54d   :  { %v568_v31 = vmul.f32 1.442695, %v561_v30 }
 0x54e   :  { %v644_v32 = vpop.permute.xlu1 %643 }
 0x54f   :  { %2593 = vpow2.f32 %v568_v31  ;;  %v649_v33 = vsel %vm599_vm6, %v644_v32, 0 }
 0x550   :  { %2372 = vmatpush3.bf16.msra.mxu0 %v649_v33 }
 0x551   :  { %2383 = vmatprep.subr.bf16.mxu0 %v2645_v44 }
 0x555   :  { %v2592_v34 = vpop.eup %2591 }
 0x556   :  { %v576_v35 = vsel %vm545_vm5, %v2592_v34, 0.0 }
 0x557   :  { %577 = vadd.xlane.f32.xlu0 %v576_v35 }
 0x559   :  { %v2594_v36 = vpop.eup %2593 }
 0x55a   :  { %v579_v37 = vsel %vm545_vm5, %v2594_v36, 0.0 }
 0x55b   :  { %580 = vadd.xlane.f32.xlu1 %v579_v37 }
 0x56c   :  { %691 = vrot.lane.b32.xlu1 %v2865_v22, %s2650_s1 }
 0x56d   :  { %739 = vrot.lane.b32.xlu0 %v2867_v23, %s2650_s1 }
 0x57f   :  { %v572_v38 = vpop.xlane.xlu1 %571 }
 0x580   :  { %2595 = vrcp.f32 %v572_v38 }
 0x583   :  { %v575_v39 = vpop.xlane.xlu1 %574 }
 0x584   :  { %2597 = vrcp.f32 %v575_v39 }
 0x58a   :  { %v2596_v40 = vpop.eup %2595 }
 0x58b   :  { %v586_v41 = vmul.f32 %v2596_v40, %v2588_v19 }
 0x58d   :  { %v590_v43 = vpack.c.bf16 %v586_v41, %v586_v41 }
 0x58e   :  { %v2598_v45 = vpop.eup %2597 }
 0x58f   :  { %v587_v46 = vmul.f32 %v2598_v45, %v2590_v24  ;;  %2368 = vmatmul.mubr.msk.bf16.vlgmr.msra.gmra.mrb[16].mxu1 %vm545_vm5, %v590_v43  ;;  %v2129_v24 = vld [vmem:[%s3222_s9] ss:$0 sm:$0xff] }
 0x590   :  { %2379 = vmatprep.mubr.msk.bf16.mxu1 %vm2646_vm3, %v2645_v44 }
 0x591   :  { %v591_v47 = vpack.c.bf16 %v587_v46, %v587_v46 }
 0x593   :  { %2374 = vmatmul.mubr.msk.bf16.vlgmr.msra.gmra.mrb[8].mxu0 %vm545_vm5, %v591_v47 }
 0x594   :  { %2385 = vmatprep.mubr.msk.bf16.mxu0 %vm2646_vm3, %v2645_v44 }
 0x5e4   :  { %v578_v22 = vpop.xlane.xlu0 %577 }
 0x5e5   :  { %2599 = vrcp.f32 %v578_v22 }
 0x5e8   :  { %v740_v23 = vpop.permute.xlu0 %739  ;;  %v581_v48 = vpop.xlane.xlu1 %580 }
 0x5e9   :  { %v745_v49 = vsel %vm599_vm6, %v740_v23, 0  ;;  %2601 = vrcp.f32 %v581_v48 }
 0x5ea   :  { %2384 = vmatpush3.bf16.msra.mxu0 %v745_v49 }
 0x5eb   :  { %2397 = vmatprep.subr.bf16.mxu0 %v2645_v44 }
 0x5ec   :  { %v692_v50 = vpop.permute.xlu1 %691 }
 0x5ed   :  { %v697_v27 = vsel %vm599_vm6, %v692_v50, 0 }
 0x5ee   :  { %2378 = vmatpush3.bf16.msra.mxu1 %v697_v27 }
 0x5ef   :  { %v2600_v52 = vpop.eup %2599  ;;  %2389 = vmatprep.subr.bf16.mxu1 %v2645_v44 }
 0x5f0   :  { %v588_v53 = vmul.f32 %v2600_v52, %v2592_v34 }
 0x5f2   :  { %v592_v54 = vpack.c.bf16 %v588_v53, %v588_v53 }
 0x5f3   :  { %v2602_v55 = vpop.eup %2601 }
 0x5f4   :  { %v589_v56 = vmul.f32 %v2602_v55, %v2594_v36  ;;  %2380 = vmatmul.mubr.msk.bf16.vlgmr.msra.gmra.mrb[20].mxu1 %vm545_vm5, %v592_v54 }
 0x5f5   :  { %2393 = vmatprep.mubr.msk.bf16.mxu1 %vm2646_vm3, %v2645_v44  ;;  %2390 = vmatpush3.bf16.msra.mxu1 %v2563_v58  ;;  %v2133_v58 = vld [vmem:[%s3224_s10] ss:$0 sm:$0xff] }
 0x5f6   :  { %v593_v57 = vpack.c.bf16 %v589_v56, %v589_v56  ;;  %2391 = vmatprep.subr.bf16.mxu1 %v2645_v44 }
 0x5f8   :  { %2386 = vmatmul.mubr.msk.bf16.vlgmr.msra.gmra.mrb[12].mxu0 %vm545_vm5, %v593_v57 }
 0x5f9   :  { %2401 = vmatprep.mubr.msk.bf16.mxu0 %vm2646_vm3, %v2645_v44  ;;  %2392 = vmatpush3.bf16.msra.mxu1 %v2564_v3 }
 0x5fa   :  { %2405 = vmatprep.subr.bf16.mxu1 %v2645_v44 }
 0x662   :  { %v637_v59 = vpop.f32.mrb[16].mxu1 }
 0x663   :  { %v2369_v60 = vpop.f32.mrb[17].mxu1 }
 0x664   :  { %v640_v61 = vpop.f32.mrb[18].mxu1 }
 0x665   :  { %v2370_v62 = vpop.f32.mrb[19].mxu1 }
 0x666   :  { %v685_v63 = vpop.f32.mrb[8].mxu0 }
 0x667   :  { %v2375_v0 = vpop.f32.mrb[9].mxu0 }
 0x668   :  { %v688_v1 = vpop.f32.mrb[10].mxu0 }
 0x669   :  { %v2376_v2 = vpop.f32.mrb[11].mxu0 }
 0x6c7   :  { %v733_v4 = vpop.f32.mrb[20].mxu1 }
 0x6c8   :  { %v2381_v5 = vpop.f32.mrb[21].mxu1 }
 0x6c9   :  { %v736_v6 = vpop.f32.mrb[22].mxu1  ;;  %v2568_v5 = vld [vmem:[%s3226_s14 + $0x8] sm:$0xff]  }
 0x6ca   :  { %v2382_v7 = vpop.f32.mrb[23].mxu1  ;;  %v2569_v6 = vld [vmem:[%s3226_s14 + $0x10] sm:$0xff]  }
 0x6cb   :  { %v781_v10 = vpop.f32.mrb[12].mxu0  ;;  %v2570_v7 = vld [vmem:[%s3226_s14 + $0x18] sm:$0xff]  }
 0x6cc   :  { %v2551_v11 = vpack.i.bf16 %v781_v10, %v733_v4  ;;  %v2387_v12 = vpop.f32.mrb[13].mxu0  ;;  %v2567_v4 = vld [vmem:[%s3226_s14] sm:$0xff]  }
 0x6cd   :  { %v784_v13 = vpop.f32.mrb[14].mxu0  ;;  %v2135_v10 = vld [vmem:[%s3227_s13] ss:$0 sm:$0xff] }
 0x6ce   :  { %v2388_v14 = vpop.f32.mrb[15].mxu0  ;;  %2552 = vrot.lane.b32.xlu1 %v2551_v11, %s2651_s29 }
 0x740   :  { %v2553_v15 = vpop.permute.xlu1 %2552 }
 0x741   :  { %v2555_v16 = vunpack.i.h.bf16 %v2553_v15  ;;  %v2554_v17 = vunpack.i.l.bf16 %v2553_v15 }
 0x743   :  { %v796_v18 = vsel %vm336_vm4, %v685_v63, %v2555_v16  ;;  %v795_v19 = vsel %vm336_vm4, %v637_v59, %v2554_v17  ;;  %v2134_v63 = vld [vmem:[%s3225_s11] ss:$0 sm:$0xff] }
 0x744   :  { %v797_v21 = vpack.c.bf16 %v796_v18, %v795_v19 }
 0x746   :  { %2394 = vmatmul.mubr.msk.bf16.vlgmr.msra.gmra.mrb[24].mxu1 %vm180_vm2, %v797_v21 }
 0x747   :  { %2413 = vmatprep.mubr.msk.bf16.mxu1 %vm2646_vm3, %v2645_v44  ;;  %2406 = vmatpush3.bf16.msra.mxu1 %v2567_v4 }
 0x748   :  { %2407 = vmatprep.subr.bf16.mxu1 %v2645_v44 }
 0x74b   :  { %2408 = vmatpush3.bf16.msra.mxu1 %v2568_v5 }
 0x74c   :  { %2409 = vmatprep.subr.bf16.mxu1 %v2645_v44 }
 0x74f   :  { %2410 = vmatpush3.bf16.msra.mxu1 %v2569_v6 }
 0x750   :  { %2411 = vmatprep.subr.bf16.mxu1 %v2645_v44 }
 0x753   :  { %2412 = vmatpush3.bf16.msra.mxu1 %v2570_v7 }
 0x754   :  { %2431 = vmatprep.subr.bf16.mxu1 %v2645_v44 }
 0x819   :  { %v858_v20 = vpop.f32.mrb[24].mxu1 }
 0x81a   :  { %v859_v25 = vadd.f32 %v2129_v24, %v858_v20  ;;  %v2395_v26 = vpop.f32.mrb[25].mxu1 }
 0x81b   :  { %v861_v28 = vpop.f32.mrb[26].mxu1 }
 0x81c   :  { %v865_v29 = vadd.f32 %v859_v25, %v2844_v8  ;;  %v862_v30 = vadd.f32 %v2129_v24, %v861_v28  ;;  %v2396_v31 = vpop.f32.mrb[27].mxu1  ;;  %v2565_v8 = vld [vmem:[%s3223_s12] sm:$0xff]  }
 0x81d   :  { %2398 = vmatpush3.bf16.msra.mxu0 %v2565_v8  ;;  %v2139_v8 = vld [vmem:[%s3228_s15] ss:$0 sm:$0xff] }
 0x81e   :  { %v866_v32 = vadd.f32 %v862_v30, %v2846_v9  ;;  %v869_v33 = vsel %vm180_vm2, %v865_v29, 0.0  ;;  %v877_v34 = vmul.f32 %v865_v29, %v865_v29  ;;  %v2566_v9 = vld [vmem:[%s3223_s12 + $0x8] sm:$0xff]   ;;  %2399 = vmatprep.subr.bf16.mxu0 %v2645_v44 }
 0x81f   :  { %870 = vadd.xlane.f32.xlu0 %v869_v33 }
 0x820   :  { %v872_v35 = vsel %vm180_vm2, %v866_v32, 0.0  ;;  %v879_v36 = vsel %vm180_vm2, %v877_v34, 0.0  ;;  %v878_v37 = vmul.f32 %v866_v32, %v866_v32 }
 0x821   :  { %873 = vadd.xlane.f32.xlu1 %v872_v35  ;;  %2400 = vmatpush3.bf16.msra.mxu0 %v2566_v9 }
 0x822   :  { %v882_v38 = vsel %vm180_vm2, %v878_v37, 0.0  ;;  %2417 = vmatprep.subr.bf16.mxu0 %v2645_v44 }
 0x823   :  { %880 = vadd.xlane.f32.xlu0 %v879_v36 }
 0x827   :  { %883 = vadd.xlane.f32.xlu0 %v882_v38 }
 0x8ac   :  { %v871_v39 = vpop.xlane.xlu0 %870 }
 0x8ad   :  { %v875_v40 = vmul.f32 0.03125, %v871_v39 }
 0x8ae   :  { %v874_v41 = vpop.xlane.xlu1 %873 }
 0x8af   :  { %v887_v45 = vmul.f32 %v875_v40, %v875_v40  ;;  %v876_v46 = vmul.f32 0.03125, %v874_v41  ;;  %v893_v55 = vsub.f32 %v865_v29, %v875_v40 }
 0x8b0   :  { %v881_v43 = vpop.xlane.xlu0 %880 }
 0x8b1   :  { %v885_v47 = vmul.f32 0.03125, %v881_v43  ;;  %v888_v48 = vmul.f32 %v876_v46, %v876_v46  ;;  %v894_v59 = vsub.f32 %v866_v32, %v876_v46 }
 0x8b3   :  { %v889_v22 = vsub.f32 %v885_v47, %v887_v45 }
 0x8b4   :  { %v884_v23 = vpop.xlane.xlu0 %883 }
 0x8b5   :  { %v891_v49 = vmax.f32 %v889_v22, 0.0  ;;  %v886_v50 = vmul.f32 0.03125, %v884_v23 }
 0x8b7   :  { %v895_v27 = vadd.f32 1e-12, %v891_v49  ;;  %v890_v52 = vsub.f32 %v886_v50, %v888_v48 }
 0x8b9   :  { %2603 = vrsqrt.f32 %v895_v27  ;;  %v892_v53 = vmax.f32 %v890_v52, 0.0  ;;  %v2571_v52 = vld [vmem:[%s3247_s24 + $0x10] sm:$0xff]  }
 0x8bb   :  { %v896_v54 = vadd.f32 1e-12, %v892_v53  ;;  %v2572_v53 = vld [vmem:[%s3247_s24 + $0x18] sm:$0xff]  }
 0x8bd   :  { %2605 = vrsqrt.f32 %v896_v54 }
 0x8c3   :  { %v2604_v56 = vpop.eup %2603 }
 0x8c4   :  { %v899_v57 = vmul.f32 %v2604_v56, %v893_v55 }
 0x8c6   :  { %v907_v62 = vmul.f32 %v2133_v58, %v899_v57 }
 0x8c7   :  { %v2606_v60 = vpop.eup %2605 }
 0x8c8   :  { %v900_v61 = vmul.f32 %v2606_v60, %v894_v59  ;;  %v915_v1 = vadd.f32 %v2134_v63, %v907_v62 }
 0x8ca   :  { %v908_v0 = vmul.f32 %v2133_v58, %v900_v61 }
 0x8cc   :  { %v916_v2 = vadd.f32 %v2134_v63, %v908_v0 }
 0x8ce   :  { %v917_v3 = vpack.c.bf16 %v916_v2, %v915_v1 }
 0x8d0   :  { %2402 = vmatmul.mubr.msk.bf16.vlgmr.msra.gmra.mrb[16].mxu0 %vm180_vm2, %v917_v3 }
 0x8d1   :  { %2421 = vmatprep.mubr.msk.bf16.mxu0 %vm2646_vm3, %v2645_v44  ;;  %2418 = vmatpush3.bf16.msra.mxu0 %v2571_v52 }
 0x8d2   :  { %2419 = vmatprep.subr.bf16.mxu0 %v2645_v44 }
 0x8d5   :  { %2420 = vmatpush3.bf16.msra.mxu0 %v2572_v53 }
 0x8d6   :  { %2425 = vmatprep.subr.bf16.mxu0 %v2645_v44 }
 0x9a3   :  { %v978_v11 = vpop.f32.mrb[16].mxu0 }
 0x9a4   :  { %v979_v12 = vadd.f32 %v2135_v10, %v978_v11  ;;  %v2403_v13 = vpop.f32.mrb[17].mxu0 }
 0x9a5   :  { %v981_v14 = vpop.f32.mrb[18].mxu0 }
 0x9a6   :  { %v987_v15 = vmul.f32 0.044715, %v979_v12  ;;  %v982_v16 = vadd.f32 %v2135_v10, %v981_v14  ;;  %v2404_v17 = vpop.f32.mrb[19].mxu0  ;;  %v985_v33 = vmul.f32 0.5, %v979_v12  ;;  %v2145_v10 = vld [vmem:[%s3229_s16] ss:$0 sm:$0xff] }
 0x9a8   :  { %v989_v18 = vmul.f32 %v987_v15, %v979_v12  ;;  %v988_v19 = vmul.f32 0.044715, %v982_v16  ;;  %v986_v34 = vmul.f32 0.5, %v982_v16 }
 0x9aa   :  { %v991_v21 = vmul.f32 %v989_v18, %v979_v12  ;;  %v990_v24 = vmul.f32 %v988_v19, %v982_v16 }
 0x9ac   :  { %v993_v20 = vadd.f32 %v991_v21, %v979_v12  ;;  %v992_v25 = vmul.f32 %v990_v24, %v982_v16  ;;  %v2152_v24 = vld [vmem:[%s3219_s7 + $0x1] ss:$0 sm:$0xff] }
 0x9ae   :  { %v995_v26 = vmul.f32 0.7978846, %v993_v20  ;;  %v994_v28 = vadd.f32 %v992_v25, %v982_v16  ;;  %v2146_v16 = vld [vmem:[%s3230_s17] ss:$0 sm:$0xff] }
 0x9b0   :  { %2607 = vtanh.f32 %v995_v26  ;;  %v996_v29 = vmul.f32 0.7978846, %v994_v28 }
 0x9b2   :  { %2609 = vtanh.f32 %v996_v29 }
 0x9ba   :  { %v2608_v30 = vpop.eup %2607 }
 0x9bb   :  { %v999_v31 = vadd.f32 1.0, %v2608_v30 }
 0x9bc   :  { %v2610_v32 = vpop.eup %2609 }
 0x9bd   :  { %v1000_v35 = vadd.f32 1.0, %v2610_v32  ;;  %v1001_v36 = vmul.f32 %v999_v31, %v985_v33 }
 0x9bf   :  { %v1002_v37 = vmul.f32 %v1000_v35, %v986_v34 }
 0x9c1   :  { %v1003_v38 = vpack.c.bf16 %v1002_v37, %v1001_v36 }
 0x9c3   :  { %2414 = vmatmul.mubr.msk.bf16.vlgmr.msra.gmra.mrb[28].mxu1 %vm1043_vm7, %v1003_v38 }
 0x9c4   :  { %2433 = vmatprep.mubr.msk.bf16.mxu1 %vm2646_vm3, %v2645_v44 }
 0xa96   :  { %v1081_v9 = vpop.f32.mrb[28].mxu1 }
 0xa97   :  { %v1082_v39 = vadd.f32 %v2139_v8, %v1081_v9  ;;  %v2415_v40 = vpop.f32.mrb[29].mxu1 }
 0xa98   :  { %v1084_v41 = vpop.f32.mrb[30].mxu1 }
 0xa99   :  { %v1088_v43 = vadd.f32 %v1082_v39, %v915_v1  ;;  %v1085_v45 = vadd.f32 %v2139_v8, %v1084_v41  ;;  %v2416_v46 = vpop.f32.mrb[31].mxu1 }
 0xa9b   :  { %v1089_v47 = vadd.f32 %v1085_v45, %v916_v2  ;;  %v1092_v22 = vsel %vm180_vm2, %v1088_v43, 0.0  ;;  %v1100_v23 = vmul.f32 %v1088_v43, %v1088_v43 }
 0xa9c   :  { %1093 = vadd.xlane.f32.xlu1 %v1092_v22 }
 0xa9d   :  { %v1095_v48 = vsel %vm180_vm2, %v1089_v47, 0.0  ;;  %v1101_v49 = vmul.f32 %v1089_v47, %v1089_v47  ;;  %v1102_v50 = vsel %vm180_vm2, %v1100_v23, 0.0 }
 0xa9e   :  { %1096 = vadd.xlane.f32.xlu0 %v1095_v48 }
 0xa9f   :  { %v1105_v27 = vsel %vm180_vm2, %v1101_v49, 0.0 }
 0xaa0   :  { %1103 = vadd.xlane.f32.xlu1 %v1102_v50 }
 0xaa2   :  { %1106 = vadd.xlane.f32.xlu0 %v1105_v27 }
 0xb29   :  { %v1094_v54 = vpop.xlane.xlu1 %1093 }
 0xb2a   :  { %v1098_v55 = vmul.f32 0.03125, %v1094_v54 }
 0xb2b   :  { %v1097_v56 = vpop.xlane.xlu0 %1096 }
 0xb2c   :  { %v1099_v57 = vmul.f32 0.03125, %v1097_v56  ;;  %v1110_v59 = vmul.f32 %v1098_v55, %v1098_v55  ;;  %v1116_v6 = vsub.f32 %v1088_v43, %v1098_v55 }
 0xb2d   :  { %v1104_v58 = vpop.xlane.xlu1 %1103 }
 0xb2e   :  { %v1108_v60 = vmul.f32 0.03125, %v1104_v58  ;;  %v1111_v62 = vmul.f32 %v1099_v57, %v1099_v57  ;;  %v1117_v11 = vsub.f32 %v1089_v47, %v1099_v57 }
 0xb2f   :  { %v1107_v61 = vpop.xlane.xlu0 %1106 }
 0xb30   :  { %v1112_v63 = vsub.f32 %v1108_v60, %v1110_v59  ;;  %v1109_v0 = vmul.f32 0.03125, %v1107_v61 }
 0xb32   :  { %v1114_v1 = vmax.f32 %v1112_v63, 0.0  ;;  %v1113_v2 = vsub.f32 %v1109_v0, %v1111_v62 }
 0xb34   :  { %v1118_v3 = vadd.f32 1e-12, %v1114_v1  ;;  %v1115_v4 = vmax.f32 %v1113_v2, 0.0 }
 0xb36   :  { %2611 = vrsqrt.f32 %v1118_v3  ;;  %v1119_v5 = vadd.f32 1e-12, %v1115_v4 }
 0xb38   :  { %2613 = vrsqrt.f32 %v1119_v5 }
 0xb40   :  { %v2612_v7 = vpop.eup %2611 }
 0xb41   :  { %v1122_v12 = vmul.f32 %v2612_v7, %v1116_v6 }
 0xb42   :  { %v2614_v13 = vpop.eup %2613 }
 0xb43   :  { %v1123_v14 = vmul.f32 %v2614_v13, %v1117_v11  ;;  %v1130_v15 = vmul.f32 %v2145_v10, %v1122_v12 }
 0xb45   :  { %v1131_v17 = vmul.f32 %v2145_v10, %v1123_v14  ;;  %v3028_v18 = vadd.f32 %v2146_v16, %v1130_v15 }
 0xb47   :  { %v3030_v19 = vadd.f32 %v2146_v16, %v1131_v17 }
 0xb49   :  { %v1140_v21 = vpack.c.bf16 %v3030_v19, %v3028_v18 }
 0xb4b   :  { %2422 = vmatmul.mubr.msk.bf16.vlgmr.msra.gmra.mrb[20].mxu0 %vm180_vm2, %v1140_v21 }
 0xb4c   :  { %2427 = vmatprep.mubr.msk.bf16.mxu0 %vm2646_vm3, %v2645_v44 }
 0xc1e   :  { %v1203_v20 = vpop.f32.mrb[20].mxu0 }
 0xc1f   :  { %v1204_v25 = vadd.f32 %v2152_v24, %v1203_v20  ;;  %v2423_v26 = vpop.f32.mrb[21].mxu0 }
 0xc20   :  { %v1206_v28 = vpop.f32.mrb[22].mxu0 }
 0xc21   :  { %v3040_v29 = vpack.c.bf16 %v1204_v25, %v1204_v25  ;;  %v1207_v30 = vadd.f32 %v2152_v24, %v1206_v28  ;;  %v2424_v31 = vpop.f32.mrb[23].mxu0 }
 0xc23   :  { %v1210_v32 = vpack.c.bf16 %v1207_v30, %v1204_v25  ;;  %1222 = vrot.lane.b32.xlu0 %v3040_v29, %s2648_s23  ;;  %v2216_v33 = vpack.c.bf16 %v1207_v30, %v1207_v30 }
 0xc25   :  { %1212 = vrot.lane.b32.xlu1 %v1210_v32, %s2647_s22 }
 0xc29   :  { %1270 = vrot.lane.b32.xlu1 %v2216_v33, %s2648_s23 }
 0xc95   :  { %v1223_v34 = vpop.permute.xlu0 %1222 }
 0xc96   :  { %v1228_v35 = vsel %vm336_vm4, %v1223_v34, 0 }
 0xc97   :  { %2426 = vmatpush3.bf16.xpose.msra.mxu0 %v1228_v35  ;;  %v1213_v36 = vpop.permute.xlu1 %1212 }
 0xc98   :  { %v3047_v37 = vcombine.low %v1213_v36, %v1213_v36  ;;  %v3049_v38 = vcombine.high %v1213_v36, %v1213_v36  ;;  %2437 = vmatprep.subr.bf16.mxu0 %v2645_v44 }
 0xc9a   :  { %1366 = vrot.lane.b32.xlu0 %v3049_v38, %s2648_s23  ;;  %1318 = vrot.lane.b32.xlu1 %v3047_v37, %s2648_s23 }
 0xc9b   :  { %v1271_v8 = vpop.permute.xlu1 %1270 }
 0xc9c   :  { %v1276_v9 = vsel %vm336_vm4, %v1271_v8, 0 }
 0xc9d   :  { %2432 = vmatpush3.bf16.xpose.msra.mxu1 %v1276_v9 }
 0xc9e   :  { %2428 = vmatmul.mubr.msk.bf16.vlgmr.msra.gmra.mrb[24].mxu0 %vm336_vm4, %v3040_v29  ;;  %2443 = vmatprep.subr.bf16.mxu1 %v2645_v44 }
 0xc9f   :  { %2439 = vmatprep.mubr.msk.bf16.mxu0 %vm2646_vm3, %v2645_v44 }
 0xca4   :  { %2434 = vmatmul.mubr.msk.bf16.vlgmr.msra.gmra.mrb[32].mxu1 %vm336_vm4, %v2216_v33 }
 0xca5   :  { %2445 = vmatprep.mubr.msk.bf16.mxu1 %vm2646_vm3, %v2645_v44 }
 0xd0c   :  { %v1367_v39 = vpop.permute.xlu0 %1366  ;;  %v1319_v40 = vpop.permute.xlu1 %1318 }
 0xd0d   :  { %v1372_v41 = vsel %vm336_vm4, %v1367_v39, 0  ;;  %v1324_v43 = vsel %vm336_vm4, %v1319_v40, 0 }
 0xd0e   :  { %2438 = vmatpush3.bf16.xpose.msra.mxu0 %v1324_v43  ;;  %2444 = vmatpush3.bf16.xpose.msra.mxu1 %v1372_v41 }
 0xd0f   :  { %2449 = vmatprep.subr.bf16.mxu0 %v2645_v44  ;;  %2455 = vmatprep.subr.bf16.mxu1 %v2645_v44 }
 0xd15   :  { %2440 = vmatmul.mubr.msk.bf16.vlgmr.msra.gmra.mrb[28].mxu0 %vm336_vm4, %v3047_v37  ;;  %2446 = vmatmul.mubr.msk.bf16.vlgmr.msra.gmra.mrb[36].mxu1 %vm336_vm4, %v3049_v38 }
 0xd16   :  { %2451 = vmatprep.mubr.msk.bf16.mxu0 %vm2646_vm3, %v2645_v44  ;;  %2457 = vmatprep.mubr.msk.bf16.mxu1 %vm2646_vm3, %v2645_v44 }
 0xd71   :  { %v1264_v45 = vpop.f32.mrb[24].mxu0 }
 0xd72   :  { %v1414_v46 = vmul.f32 0.25, %v1264_v45  ;;  %v2429_v47 = vpop.f32.mrb[25].mxu0 }
 0xd73   :  { %v1267_v22 = vpop.f32.mrb[26].mxu0 }
 0xd74   :  { %v2430_v23 = vpop.f32.mrb[27].mxu0  ;;  %v1418_v48 = vadd.f32 %v1414_v46, %v2901_v42 }
 0xd76   :  { %v1422_v49 = vsel %vm545_vm5, %v1418_v48, -inf }
 0xd77   :  { %1423 = vmax.xlane.f32.xlu1 %v1422_v49  ;;  %v1312_v50 = vpop.f32.mrb[32].mxu1 }
 0xd78   :  { %v1415_v27 = vmul.f32 0.25, %v1312_v50  ;;  %v2435_v52 = vpop.f32.mrb[33].mxu1 }
 0xd79   :  { %v1315_v53 = vpop.f32.mrb[34].mxu1 }
 0xd7a   :  { %v2436_v54 = vpop.f32.mrb[35].mxu1  ;;  %v1419_v55 = vadd.f32 %v1415_v27, %v2905_v51 }
 0xd7b   :  { %v2573_v54 = vld [vmem:[%s3221_s8 + $0x10] sm:$0xff]  }
 0xd7c   :  { %v1425_v56 = vsel %vm545_vm5, %v1419_v55, -inf }
 0xd7d   :  { %1426 = vmax.xlane.f32.xlu0 %v1425_v56 }
 0xde8   :  { %v1360_v57 = vpop.f32.mrb[28].mxu0  ;;  %v1408_v58 = vpop.f32.mrb[36].mxu1 }
 0xde9   :  { %v1416_v59 = vmul.f32 0.25, %v1360_v57  ;;  %v1417_v60 = vmul.f32 0.25, %v1408_v58  ;;  %v2441_v61 = vpop.f32.mrb[29].mxu0  ;;  %v2447_v62 = vpop.f32.mrb[37].mxu1 }
 0xdea   :  { %v1363_v63 = vpop.f32.mrb[30].mxu0  ;;  %v1411_v0 = vpop.f32.mrb[38].mxu1 }
 0xdeb   :  { %v2442_v1 = vpop.f32.mrb[31].mxu0  ;;  %v2448_v2 = vpop.f32.mrb[39].mxu1  ;;  %v1420_v3 = vadd.f32 %v1416_v59, %v2901_v42  ;;  %v1421_v4 = vadd.f32 %v1417_v60, %v2905_v51  ;;  %v2574_v63 = vld [vmem:[%s3221_s8 + $0x18] sm:$0xff]  }
 0xded   :  { %v1428_v5 = vsel %vm545_vm5, %v1420_v3, -inf  ;;  %v1431_v6 = vsel %vm545_vm5, %v1421_v4, -inf }
 0xdee   :  { %1429 = vmax.xlane.f32.xlu0 %v1428_v5  ;;  %1432 = vmax.xlane.f32.xlu1 %v1431_v6 }
 0xdff   :  { %1518 = vrot.lane.b32.xlu1 %v2216_v33, %s2650_s1 }
 0xe04   :  { %1470 = vrot.lane.b32.xlu0 %v3040_v29, %s2650_s1  ;;  %v1424_v7 = vpop.xlane.xlu1 %1423 }
 0xe05   :  { %v1434_v11 = vsub.f32 %v1418_v48, %v1424_v7 }
 0xe07   :  { %v1438_v13 = vmul.f32 1.442695, %v1434_v11 }
 0xe09   :  { %2615 = vpow2.f32 %v1438_v13 }
 0xe0a   :  { %v1427_v10 = vpop.xlane.xlu0 %1426 }
 0xe0b   :  { %v1435_v12 = vsub.f32 %v1419_v55, %v1427_v10 }
 0xe0d   :  { %v1440_v14 = vmul.f32 1.442695, %v1435_v12 }
 0xe0f   :  { %2617 = vpow2.f32 %v1440_v14 }
 0xe13   :  { %v2616_v42 = vpop.eup %2615 }
 0xe14   :  { %v1446_v15 = vsel %vm545_vm5, %v2616_v42, 0.0 }
 0xe19   :  { %v2618_v51 = vpop.eup %2617 }
 0xe1a   :  { %v1449_v16 = vsel %vm545_vm5, %v2618_v51, 0.0 }
 0xe23   :  { %1447 = vadd.xlane.f32.xlu0 %v1446_v15  ;;  %1450 = vadd.xlane.f32.xlu1 %v1449_v16  ;;  %v2173_v15 = vld [vmem:[%s3222_s9 + $0x1] ss:$0 sm:$0xff] }
 0xe7b   :  { %v1430_v17 = vpop.xlane.xlu0 %1429  ;;  %v1433_v21 = vpop.xlane.xlu1 %1432 }
 0xe7c   :  { %v1436_v24 = vsub.f32 %v1420_v3, %v1430_v17  ;;  %v1437_v20 = vsub.f32 %v1421_v4, %v1433_v21 }
 0xe7e   :  { %v1442_v25 = vmul.f32 1.442695, %v1436_v24  ;;  %v1444_v26 = vmul.f32 1.442695, %v1437_v20 }
 0xe7f   :  { %v1471_v28 = vpop.permute.xlu0 %1470  ;;  %v1519_v29 = vpop.permute.xlu1 %1518 }
 0xe80   :  { %2619 = vpow2.f32 %v1442_v25  ;;  %v1476_v30 = vsel %vm599_vm6, %v1471_v28, 0  ;;  %v1524_v31 = vsel %vm599_vm6, %v1519_v29, 0 }
 0xe81   :  { %2621 = vpow2.f32 %v1444_v26  ;;  %2450 = vmatpush3.bf16.msra.mxu0 %v1476_v30  ;;  %2456 = vmatpush3.bf16.msra.mxu1 %v1524_v31 }
 0xe82   :  { %2461 = vmatprep.subr.bf16.mxu0 %v2645_v44  ;;  %2467 = vmatprep.subr.bf16.mxu1 %v2645_v44 }
 0xe8a   :  { %v2620_v32 = vpop.eup %2619 }
 0xe8b   :  { %v2622_v33 = vpop.eup %2621  ;;  %v1452_v34 = vsel %vm545_vm5, %v2620_v32, 0.0 }
 0xe8c   :  { %1453 = vadd.xlane.f32.xlu0 %v1452_v34  ;;  %v1455_v35 = vsel %vm545_vm5, %v2622_v33, 0.0 }
 0xe8d   :  { %1456 = vadd.xlane.f32.xlu1 %v1455_v35 }
 0xe9e   :  { %1566 = vrot.lane.b32.xlu1 %v3047_v37, %s2650_s1 }
 0xea2   :  { %1614 = vrot.lane.b32.xlu0 %v3049_v38, %s2650_s1 }
 0xeb0   :  { %v1448_v36 = vpop.xlane.xlu0 %1447  ;;  %v1451_v8 = vpop.xlane.xlu1 %1450 }
 0xeb1   :  { %2623 = vrcp.f32 %v1448_v36 }
 0xeb2   :  { %2625 = vrcp.f32 %v1451_v8 }
 0xebb   :  { %v2624_v9 = vpop.eup %2623 }
 0xebc   :  { %v2626_v39 = vpop.eup %2625  ;;  %v1462_v40 = vmul.f32 %v2624_v9, %v2616_v42 }
 0xebd   :  { %v1463_v41 = vmul.f32 %v2626_v39, %v2618_v51 }
 0xebe   :  { %v1466_v43 = vpack.c.bf16 %v1462_v40, %v1462_v40 }
 0xebf   :  { %v1467_v45 = vpack.c.bf16 %v1463_v41, %v1463_v41 }
 0xec0   :  { %2452 = vmatmul.mubr.msk.bf16.vlgmr.msra.gmra.mrb[32].mxu0 %vm545_vm5, %v1466_v43 }
 0xec1   :  { %2458 = vmatmul.mubr.msk.bf16.vlgmr.msra.gmra.mrb[40].mxu1 %vm545_vm5, %v1467_v45  ;;  %2463 = vmatprep.mubr.msk.bf16.mxu0 %vm2646_vm3, %v2645_v44 }
 0xec2   :  { %2469 = vmatprep.mubr.msk.bf16.mxu1 %vm2646_vm3, %v2645_v44 }
 0xf19   :  { %v1454_v37 = vpop.xlane.xlu0 %1453 }
 0xf1a   :  { %2627 = vrcp.f32 %v1454_v37  ;;  %v1457_v38 = vpop.xlane.xlu1 %1456 }
 0xf1b   :  { %2629 = vrcp.f32 %v1457_v38 }
 0xf1d   :  { %v1615_v46 = vpop.permute.xlu0 %1614 }
 0xf1e   :  { %v1620_v47 = vsel %vm599_vm6, %v1615_v46, 0  ;;  %v1567_v22 = vpop.permute.xlu1 %1566 }
 0xf1f   :  { %v1572_v23 = vsel %vm599_vm6, %v1567_v22, 0  ;;  %2468 = vmatpush3.bf16.msra.mxu1 %v1620_v47 }
 0xf20   :  { %2462 = vmatpush3.bf16.msra.mxu0 %v1572_v23  ;;  %2481 = vmatprep.subr.bf16.mxu1 %v2645_v44 }
 0xf21   :  { %2473 = vmatprep.subr.bf16.mxu0 %v2645_v44 }
 0xf24   :  { %v2628_v48 = vpop.eup %2627 }
 0xf25   :  { %v2630_v49 = vpop.eup %2629  ;;  %v1464_v50 = vmul.f32 %v2628_v48, %v2620_v32 }
 0xf26   :  { %v1465_v27 = vmul.f32 %v2630_v49, %v2622_v33 }
 0xf27   :  { %v1468_v52 = vpack.c.bf16 %v1464_v50, %v1464_v50 }
 0xf28   :  { %v1469_v53 = vpack.c.bf16 %v1465_v27, %v1465_v27 }
 0xf29   :  { %2464 = vmatmul.mubr.msk.bf16.vlgmr.msra.gmra.mrb[36].mxu0 %vm545_vm5, %v1468_v52  ;;  %v2179_v52 = vld [vmem:[%s3224_s10 + $0x1] ss:$0 sm:$0xff] }
 0xf2a   :  { %2470 = vmatmul.mubr.msk.bf16.vlgmr.msra.gmra.mrb[44].mxu1 %vm545_vm5, %v1469_v53  ;;  %2477 = vmatprep.mubr.msk.bf16.mxu0 %vm2646_vm3, %v2645_v44 }
 0xf2b   :  { %2485 = vmatprep.mubr.msk.bf16.mxu1 %vm2646_vm3, %v2645_v44  ;;  %2474 = vmatpush3.bf16.msra.mxu0 %v2573_v54 }
 0xf2c   :  { %2475 = vmatprep.subr.bf16.mxu0 %v2645_v44 }
 0xf2f   :  { %2476 = vmatpush3.bf16.msra.mxu0 %v2574_v63  ;;  %v2578_v63 = vld [vmem:[%s3226_s14 + $0x28] sm:$0xff]  }
 0xf30   :  { %2489 = vmatprep.subr.bf16.mxu0 %v2645_v44 }
 0xf93   :  { %v1512_v55 = vpop.f32.mrb[32].mxu0 }
 0xf94   :  { %v1560_v56 = vpop.f32.mrb[40].mxu1  ;;  %v2453_v57 = vpop.f32.mrb[33].mxu0 }
 0xf95   :  { %v2459_v58 = vpop.f32.mrb[41].mxu1  ;;  %v1515_v59 = vpop.f32.mrb[34].mxu0  ;;  %v2180_v57 = vld [vmem:[%s3225_s11 + $0x1] ss:$0 sm:$0xff] }
 0xf96   :  { %v1563_v60 = vpop.f32.mrb[42].mxu1  ;;  %v2454_v61 = vpop.f32.mrb[35].mxu0 }
 0xf97   :  { %v2460_v62 = vpop.f32.mrb[43].mxu1 }
 0xf98   :  { %v2577_v62 = vld [vmem:[%s3226_s14 + $0x20] sm:$0xff]  }
 0xffc   :  { %v1608_v0 = vpop.f32.mrb[36].mxu0 }
 0xffd   :  { %v1656_v1 = vpop.f32.mrb[44].mxu1  ;;  %v2465_v2 = vpop.f32.mrb[37].mxu0 }
 0xffe   :  { %v2556_v3 = vpack.i.bf16 %v1656_v1, %v1608_v0  ;;  %v2471_v4 = vpop.f32.mrb[45].mxu1  ;;  %v1611_v5 = vpop.f32.mrb[38].mxu0  ;;  %v2579_v0 = vld [vmem:[%s3226_s14 + $0x30] sm:$0xff]   ;;  %v2580_v1 = vld [vmem:[%s3226_s14 + $0x38] sm:$0xff]   ;;  %v2186_v2 = vld [vmem:[%s3227_s13 + $0x1] ss:$0 sm:$0xff] }
 0xfff   :  { %v1659_v6 = vpop.f32.mrb[46].mxu1  ;;  %v2466_v7 = vpop.f32.mrb[39].mxu0 }
0x1000   :  { %2557 = vrot.lane.b32.xlu1 %v2556_v3, %s2651_s29  ;;  %v2472_v10 = vpop.f32.mrb[47].mxu1 }
0x1072   :  { %v2558_v11 = vpop.permute.xlu1 %2557 }
0x1073   :  { %v2560_v12 = vunpack.i.h.bf16 %v2558_v11  ;;  %v2559_v13 = vunpack.i.l.bf16 %v2558_v11 }
0x1075   :  { %v1671_v14 = vsel %vm336_vm4, %v1560_v56, %v2560_v12  ;;  %v1670_v42 = vsel %vm336_vm4, %v1512_v55, %v2559_v13 }
0x1076   :  { %v1672_v51 = vpack.c.bf16 %v1671_v14, %v1670_v42 }
0x1078   :  { %2478 = vmatmul.mubr.msk.bf16.vlgmr.msra.gmra.mrb[40].mxu0 %vm180_vm2, %v1672_v51 }
0x1079   :  { %2497 = vmatprep.mubr.msk.bf16.mxu0 %vm2646_vm3, %v2645_v44  ;;  %2490 = vmatpush3.bf16.msra.mxu0 %v2577_v62 }
0x107a   :  { %2491 = vmatprep.subr.bf16.mxu0 %v2645_v44 }
0x107d   :  { %2492 = vmatpush3.bf16.msra.mxu0 %v2578_v63  ;;  %v2207_v63 = vld [vmem:[%s3229_s16 + $0x1] ss:$0 sm:$0xff] }
0x107e   :  { %2493 = vmatprep.subr.bf16.mxu0 %v2645_v44 }
0x1081   :  { %2494 = vmatpush3.bf16.msra.mxu0 %v2579_v0 }
0x1082   :  { %2495 = vmatprep.subr.bf16.mxu0 %v2645_v44 }
0x1085   :  { %2496 = vmatpush3.bf16.msra.mxu0 %v2580_v1 }
0x114b   :  { %v1735_v16 = vpop.f32.mrb[40].mxu0 }
0x114c   :  { %v1736_v17 = vadd.f32 %v2173_v15, %v1735_v16  ;;  %v2479_v21 = vpop.f32.mrb[41].mxu0 }
0x114d   :  { %v1738_v24 = vpop.f32.mrb[42].mxu0 }
0x114e   :  { %v1742_v20 = vadd.f32 %v1736_v17, %v3028_v18  ;;  %v1739_v25 = vadd.f32 %v2173_v15, %v1738_v24  ;;  %v2480_v26 = vpop.f32.mrb[43].mxu0  ;;  %v2575_v18 = vld [vmem:[%s3223_s12 + $0x10] sm:$0xff]  }
0x114f   :  { %2482 = vmatpush3.bf16.msra.mxu1 %v2575_v18 }
0x1150   :  { %v1743_v28 = vadd.f32 %v1739_v25, %v3030_v19  ;;  %v1748_v29 = vsel %vm180_vm2, %v1742_v20, 0.0  ;;  %v1756_v30 = vmul.f32 %v1742_v20, %v1742_v20  ;;  %v2576_v19 = vld [vmem:[%s3223_s12 + $0x18] sm:$0xff]   ;;  %2483 = vmatprep.subr.bf16.mxu1 %v2645_v44 }
0x1151   :  { %1749 = vadd.xlane.f32.xlu0 %v1748_v29 }
0x1152   :  { %v1751_v31 = vsel %vm180_vm2, %v1743_v28, 0.0  ;;  %v1758_v32 = vsel %vm180_vm2, %v1756_v30, 0.0  ;;  %v1757_v33 = vmul.f32 %v1743_v28, %v1743_v28 }
0x1153   :  { %1752 = vadd.xlane.f32.xlu1 %v1751_v31  ;;  %2484 = vmatpush3.bf16.msra.mxu1 %v2576_v19 }
0x1154   :  { %v1761_v34 = vsel %vm180_vm2, %v1757_v33, 0.0  ;;  %2501 = vmatprep.subr.bf16.mxu1 %v2645_v44  ;;  %v2199_v33 = vld [vmem:[%s3228_s15 + $0x1] ss:$0 sm:$0xff] }
0x1155   :  { %1759 = vadd.xlane.f32.xlu0 %v1758_v32 }
0x1159   :  { %1762 = vadd.xlane.f32.xlu0 %v1761_v34 }
0x11de   :  { %v1750_v35 = vpop.xlane.xlu0 %1749 }
0x11df   :  { %v1754_v36 = vmul.f32 0.03125, %v1750_v35 }
0x11e0   :  { %v1753_v8 = vpop.xlane.xlu1 %1752 }
0x11e1   :  { %v1766_v39 = vmul.f32 %v1754_v36, %v1754_v36  ;;  %v1755_v40 = vmul.f32 0.03125, %v1753_v8  ;;  %v1772_v49 = vsub.f32 %v1742_v20, %v1754_v36 }
0x11e2   :  { %v1760_v9 = vpop.xlane.xlu0 %1759 }
0x11e3   :  { %v1764_v41 = vmul.f32 0.03125, %v1760_v9  ;;  %v1767_v37 = vmul.f32 %v1755_v40, %v1755_v40  ;;  %v1773_v53 = vsub.f32 %v1743_v28, %v1755_v40 }
0x11e5   :  { %v1768_v43 = vsub.f32 %v1764_v41, %v1766_v39 }
0x11e6   :  { %v1763_v45 = vpop.xlane.xlu0 %1762 }
0x11e7   :  { %v1770_v38 = vmax.f32 %v1768_v43, 0.0  ;;  %v1765_v46 = vmul.f32 0.03125, %v1763_v45 }
0x11e9   :  { %v1774_v47 = vadd.f32 1e-12, %v1770_v38  ;;  %v1769_v22 = vsub.f32 %v1765_v46, %v1767_v37  ;;  %v2581_v46 = vld [vmem:[%s3231_s18] sm:$0xff]  }
0x11eb   :  { %2631 = vrsqrt.f32 %v1774_v47  ;;  %v1771_v23 = vmax.f32 %v1769_v22, 0.0  ;;  %v2582_v47 = vld [vmem:[%s3231_s18 + $0x8] sm:$0xff]  }
0x11ed   :  { %v1775_v48 = vadd.f32 1e-12, %v1771_v23 }
0x11ef   :  { %2633 = vrsqrt.f32 %v1775_v48 }
0x11f5   :  { %v2632_v50 = vpop.eup %2631 }
0x11f6   :  { %v1778_v27 = vmul.f32 %v2632_v50, %v1772_v49 }
0x11f8   :  { %v1786_v56 = vmul.f32 %v2179_v52, %v1778_v27 }
0x11f9   :  { %v2634_v54 = vpop.eup %2633 }
0x11fa   :  { %v1779_v55 = vmul.f32 %v2634_v54, %v1773_v53  ;;  %v1794_v59 = vadd.f32 %v2180_v57, %v1786_v56 }
0x11fc   :  { %v1787_v58 = vmul.f32 %v2179_v52, %v1779_v55 }
0x11fe   :  { %v1795_v60 = vadd.f32 %v2180_v57, %v1787_v58 }
0x1200   :  { %v1796_v61 = vpack.c.bf16 %v1795_v60, %v1794_v59 }
0x1202   :  { %2486 = vmatmul.mubr.msk.bf16.vlgmr.msra.gmra.mrb[48].mxu1 %vm180_vm2, %v1796_v61 }
0x1203   :  { %2505 = vmatprep.mubr.msk.bf16.mxu1 %vm2646_vm3, %v2645_v44  ;;  %2502 = vmatpush3.bf16.msra.mxu1 %v2581_v46 }
0x1204   :  { %2503 = vmatprep.subr.bf16.mxu1 %v2645_v44 }
0x1207   :  { %2504 = vmatpush3.bf16.msra.mxu1 %v2582_v47 }
0x12d5   :  { %v1859_v3 = vpop.f32.mrb[48].mxu1 }
0x12d6   :  { %v1860_v4 = vadd.f32 %v2186_v2, %v1859_v3  ;;  %v2487_v5 = vpop.f32.mrb[49].mxu1  ;;  %v2208_v3 = vld [vmem:[%s3230_s17 + $0x1] ss:$0 sm:$0xff] }
0x12d7   :  { %v1862_v6 = vpop.f32.mrb[50].mxu1 }
0x12d8   :  { %v1868_v7 = vmul.f32 0.044715, %v1860_v4  ;;  %v1863_v10 = vadd.f32 %v2186_v2, %v1862_v6  ;;  %v2488_v11 = vpop.f32.mrb[51].mxu1  ;;  %v1866_v26 = vmul.f32 0.5, %v1860_v4 }
0x12da   :  { %v1870_v12 = vmul.f32 %v1868_v7, %v1860_v4  ;;  %v1869_v13 = vmul.f32 0.044715, %v1863_v10  ;;  %v1867_v28 = vmul.f32 0.5, %v1863_v10 }
0x12dc   :  { %v1872_v14 = vmul.f32 %v1870_v12, %v1860_v4  ;;  %v1871_v42 = vmul.f32 %v1869_v13, %v1863_v10 }
0x12de   :  { %v1874_v51 = vadd.f32 %v1872_v14, %v1860_v4  ;;  %v1873_v15 = vmul.f32 %v1871_v42, %v1863_v10  ;;  %v2209_v14 = vld [vmem:[%s3233_s19] ss:$0 sm:$0xff] }
0x12e0   :  { %v1876_v16 = vmul.f32 0.7978846, %v1874_v51  ;;  %v1875_v17 = vadd.f32 %v1873_v15, %v1863_v10 }
0x12e2   :  { %2635 = vtanh.f32 %v1876_v16  ;;  %v1877_v21 = vmul.f32 0.7978846, %v1875_v17 }
0x12e4   :  { %2637 = vtanh.f32 %v1877_v21 }
0x12ec   :  { %v2636_v24 = vpop.eup %2635 }
0x12ed   :  { %v1880_v20 = vadd.f32 1.0, %v2636_v24 }
0x12ee   :  { %v2638_v25 = vpop.eup %2637 }
0x12ef   :  { %v1881_v29 = vadd.f32 1.0, %v2638_v25  ;;  %v1882_v30 = vmul.f32 %v1880_v20, %v1866_v26 }
0x12f1   :  { %v1883_v31 = vmul.f32 %v1881_v29, %v1867_v28 }
0x12f3   :  { %v1884_v32 = vpack.c.bf16 %v1883_v31, %v1882_v30 }
0x12f5   :  { %2498 = vmatmul.mubr.msk.bf16.vlgmr.msra.gmra.mrb[44].mxu0 %vm1043_vm7, %v1884_v32 }
0x13c8   :  { %v1963_v34 = vpop.f32.mrb[44].mxu0 }
0x13c9   :  { %v1964_v18 = vadd.f32 %v2199_v33, %v1963_v34  ;;  %v2499_v19 = vpop.f32.mrb[45].mxu0 }
0x13ca   :  { %v1966_v35 = vpop.f32.mrb[46].mxu0 }
0x13cb   :  { %v1970_v36 = vadd.f32 %v1964_v18, %v1794_v59  ;;  %v1967_v8 = vadd.f32 %v2199_v33, %v1966_v35  ;;  %v2500_v9 = vpop.f32.mrb[47].mxu0 }
0x13cd   :  { %v1971_v39 = vadd.f32 %v1967_v8, %v1795_v60  ;;  %v1976_v40 = vsel %vm180_vm2, %v1970_v36, 0.0  ;;  %v1984_v41 = vmul.f32 %v1970_v36, %v1970_v36 }
0x13ce   :  { %1977 = vadd.xlane.f32.xlu1 %v1976_v40 }
0x13cf   :  { %v1979_v43 = vsel %vm180_vm2, %v1971_v39, 0.0  ;;  %v1985_v45 = vmul.f32 %v1971_v39, %v1971_v39  ;;  %v1986_v37 = vsel %vm180_vm2, %v1984_v41, 0.0 }
0x13d0   :  { %1980 = vadd.xlane.f32.xlu0 %v1979_v43 }
0x13d1   :  { %v1989_v38 = vsel %vm180_vm2, %v1985_v45, 0.0 }
0x13d2   :  { %1987 = vadd.xlane.f32.xlu1 %v1986_v37 }
0x13d4   :  { %1990 = vadd.xlane.f32.xlu0 %v1989_v38 }
0x145b   :  { %v1978_v22 = vpop.xlane.xlu1 %1977 }
0x145c   :  { %v1982_v23 = vmul.f32 0.03125, %v1978_v22 }
0x145d   :  { %v1981_v48 = vpop.xlane.xlu0 %1980 }
0x145e   :  { %v1983_v49 = vmul.f32 0.03125, %v1981_v48  ;;  %v1994_v27 = vmul.f32 %v1982_v23, %v1982_v23  ;;  %v2000_v44 = vsub.f32 %v1970_v36, %v1982_v23 }
0x145f   :  { %v1988_v50 = vpop.xlane.xlu1 %1987 }
0x1460   :  { %v1992_v52 = vmul.f32 0.03125, %v1988_v50  ;;  %v1995_v54 = vmul.f32 %v1983_v49, %v1983_v49  ;;  %v2001_v0 = vsub.f32 %v1971_v39, %v1983_v49 }
0x1461   :  { %v1991_v53 = vpop.xlane.xlu0 %1990 }
0x1462   :  { %v1996_v55 = vsub.f32 %v1992_v52, %v1994_v27  ;;  %v1993_v56 = vmul.f32 0.03125, %v1991_v53 }
0x1464   :  { %v1998_v57 = vmax.f32 %v1996_v55, 0.0  ;;  %v1997_v58 = vsub.f32 %v1993_v56, %v1995_v54 }
0x1466   :  { %v2002_v59 = vadd.f32 1e-12, %v1998_v57  ;;  %v1999_v60 = vmax.f32 %v1997_v58, 0.0 }
0x1468   :  { %2639 = vrsqrt.f32 %v2002_v59  ;;  %v2003_v61 = vadd.f32 1e-12, %v1999_v60 }
0x146a   :  { %2641 = vrsqrt.f32 %v2003_v61 }
0x1472   :  { %v2640_v62 = vpop.eup %2639 }
0x1473   :  { %v2006_v1 = vmul.f32 %v2640_v62, %v2000_v44 }
0x1474   :  { %v2642_v2 = vpop.eup %2641 }
0x1475   :  { %v2007_v4 = vmul.f32 %v2642_v2, %v2001_v0  ;;  %v2014_v5 = vmul.f32 %v2207_v63, %v2006_v1 }
0x1477   :  { %v2015_v6 = vmul.f32 %v2207_v63, %v2007_v4  ;;  %v2022_v7 = vadd.f32 %v2208_v3, %v2014_v5 }
0x1479   :  { %v2023_v10 = vadd.f32 %v2208_v3, %v2015_v6  ;;  %v2094_v11 = vsel %vm180_vm2, %v2022_v7, 0.0 }
0x147a   :  { %2096 = vst [vmem:[%s3232_s21] sm:$0xff] %v2094_v11 }
0x147b   :  { %v2024_v12 = vpack.c.bf16 %v2023_v10, %v2022_v7  ;;  %v2095_v13 = vsel %vm180_vm2, %v2023_v10, 0.0 }
0x147c   :  { %2097 = vst [vmem:[%s3232_s21 + $0x8] sm:$0xff] %v2095_v13 }
0x147d   :  { %2506 = vmatmul.mubr.msk.bf16.vlgmr.msra.gmra.mrb[52].mxu1 %vm180_vm2, %v2024_v12 }
0x1550   :  { %v2085_v42 = vpop.f32.mrb[52].mxu1 }
0x1551   :  { %v2086_v51 = vadd.f32 %v2209_v14, %v2085_v42  ;;  %v2507_v15 = vpop.f32.mrb[53].mxu1 }
0x1552   :  { %v2088_v16 = vpop.f32.mrb[54].mxu1 }
0x1553   :  { %2092 = vst [vmem:[%s3234_s20] sm:$0xff] %v2086_v51  ;;  %v2089_v17 = vadd.f32 %v2209_v14, %v2088_v16  ;;  %v2508_v21 = vpop.f32.mrb[55].mxu1 }
0x1555   :  { %2093 = vst [vmem:[%s3234_s20 + $0x8] sm:$0xff] %v2089_v17 }

</bundles_post_ra>
